<compile_context>
chip_gen: v6e
topology: v6e:2x2x1
jax: 0.10.0
libtpu: 0.0.40
codegen_flags: <defaults>
</compile_context>

<pallas_src>
import functools

import jax
import jax.numpy as jnp
from jax.experimental import pallas as pl
from jax.experimental.pallas import tpu as pltpu


_TM_MAX = 512          # M-tile rows (review: ~85% of HBM roofline at 512)
_VMEM_LIMIT = 32 * 1024 * 1024   # safe on v5e/v6e/v7x; working set << this


def _round_up(x, m):
    return (x + m - 1) // m * m


# ---------------------------------------------------------------------------
# Pass 1: conv-as-matmul (bf16 MXU, f32 accum) + bias
#         [+ LeakyReLU when no BN follows]
#         [+ per-tile masked sum / sum-of-squares partials when BN follows]
# ---------------------------------------------------------------------------
def _conv_pass1_kernel(p_ref, w_ref, b_ref, *out_refs, tm, m_true, use_act,
                       emit_stats):
    y_ref = out_refs[0]
    # MXU matmul: bf16 operands, f32 accumulation.
    y = jnp.dot(p_ref[...], w_ref[...], preferred_element_type=jnp.float32)
    y = y + b_ref[...]                                   # f32 epilogue

    if emit_stats:
        stats_ref = out_refs[1]
        # Mask rows that exist only because of M padding so that the batch
        # statistics stay exact (padded rows would otherwise contribute bias).
        row0 = pl.program_id(0) * tm
        rows = row0 + jax.lax.broadcasted_iota(jnp.int32, (tm, 1), 0)
        valid = rows < m_true
        ym = jnp.where(valid, y, 0.0)
        s = jnp.sum(ym, axis=0, keepdims=True)           # (1, C) partial sum
        s2 = jnp.sum(ym * ym, axis=0, keepdims=True)     # (1, C) partial sumsq
        pad = jnp.zeros((6, s.shape[1]), jnp.float32)
        stats_ref[0] = jnp.concatenate([s, s2, pad], axis=0)   # (8, C) block

    if use_act:
        y = jnp.maximum(y, 0.2 * y)                      # LeakyReLU(0.2)
    y_ref[...] = y.astype(y_ref.dtype)


def _conv_pass1(patches, w_mat, bias, *, tm, m_true, use_act, emit_stats):
    m_pad, k_pad = patches.shape
    c_pad = w_mat.shape[1]
    num_tiles = m_pad // tm

    kernel = functools.partial(_conv_pass1_kernel, tm=tm, m_true=m_true,
                               use_act=use_act, emit_stats=emit_stats)

    out_shape = [jax.ShapeDtypeStruct((m_pad, c_pad), jnp.float32)]
    out_specs = [pl.BlockSpec((tm, c_pad), lambda i: (i, 0))]
    if emit_stats:
        out_shape.append(jax.ShapeDtypeStruct((num_tiles, 8, c_pad),
                                              jnp.float32))
        out_specs.append(pl.BlockSpec((1, 8, c_pad), lambda i: (i, 0, 0)))

    outs = pl.pallas_call(
        kernel,
        out_shape=tuple(out_shape),
        grid=(num_tiles,),
        in_specs=[
            pl.BlockSpec((tm, k_pad), lambda i: (i, 0)),      # patches tile
            pl.BlockSpec((k_pad, c_pad), lambda i: (0, 0)),   # weights resident
            pl.BlockSpec((1, c_pad), lambda i: (0, 0)),       # bias resident
        ],
        out_specs=tuple(out_specs),
        compiler_params=pltpu.CompilerParams(
            dimension_semantics=("parallel",),
            vmem_limit_bytes=_VMEM_LIMIT),
    )(patches, w_mat, bias)

    if isinstance(outs, (tuple, list)):
        return tuple(outs)
    return (outs,)


# ---------------------------------------------------------------------------
# Pass 2 (BN layers only): reduce the tiny per-tile partials in-kernel,
# apply (y - mean) * rsqrt(var + eps) and LeakyReLU(0.2) per M tile.
# ---------------------------------------------------------------------------
def _bn_act_kernel(y_ref, stats_ref, o_ref, *, m_true):
    st = stats_ref[...]                         # (num_tiles, 8, C) partials
    tot = jnp.sum(st, axis=0)                   # (8, C); row0 = sum, row1 = sumsq
    inv_m = 1.0 / float(m_true)
    mean = tot[0:1, :] * inv_m                  # (1, C)
    var = tot[1:2, :] * inv_m - mean * mean     # E[y^2] - E[y]^2  (f32)
    var = jnp.maximum(var, 0.0)
    inv_std = jax.lax.rsqrt(var + 1e-5)
    y = (y_ref[...] - mean) * inv_std
    o_ref[...] = jnp.maximum(y, 0.2 * y).astype(o_ref.dtype)


def _bn_act(y, stats, *, tm, m_true):
    m_pad, c_pad = y.shape
    num_tiles = m_pad // tm
    kernel = functools.partial(_bn_act_kernel, m_true=m_true)
    return pl.pallas_call(
        kernel,
        out_shape=jax.ShapeDtypeStruct((m_pad, c_pad), jnp.float32),
        grid=(num_tiles,),
        in_specs=[
            pl.BlockSpec((tm, c_pad), lambda i: (i, 0)),             # y tile
            pl.BlockSpec((num_tiles, 8, c_pad), lambda i: (0, 0, 0)),  # stats
        ],
        out_specs=pl.BlockSpec((tm, c_pad), lambda i: (i, 0)),
        compiler_params=pltpu.CompilerParams(
            dimension_semantics=("parallel",),
            vmem_limit_bytes=_VMEM_LIMIT),
    )(y, stats)


# ---------------------------------------------------------------------------
# Wrapper-side layout glue (no FLOPs beyond the trivial padding/cast).
# ---------------------------------------------------------------------------
def _im2col(x_nhwc, kw, stride, pad):
    """Extract kxk patches, (dy, dx, c) ordering with c fastest."""
    N, H, W, C = x_nhwc.shape
    xp = jnp.pad(x_nhwc, ((0, 0), (pad, pad), (pad, pad), (0, 0)))
    Ho = (H + 2 * pad - kw) // stride + 1
    Wo = (W + 2 * pad - kw) // stride + 1
    cols = []
    for dy in range(kw):
        for dx in range(kw):
            cols.append(
                xp[:, dy:dy + stride * (Ho - 1) + 1:stride,
                      dx:dx + stride * (Wo - 1) + 1:stride, :]
            )
    p = jnp.concatenate(cols, axis=-1)          # (N, Ho, Wo, kw*kw*C)
    return p.reshape(N * Ho * Wo, kw * kw * C), (N, Ho, Wo)


def _layer_forward(x_nhwc, p, kw, padw):
    cout, cin = p["w"].shape[0], p["w"].shape[1]
    patches, (N, Ho, Wo) = _im2col(x_nhwc, kw, p["stride"], padw)
    M, K = patches.shape

    K_pad = _round_up(K, 128)                   # aligned MXU contraction
    C_pad = _round_up(cout, 128)                # lane-dense output
    tm = min(_TM_MAX, _round_up(M, 16))         # bf16-friendly sublane multiple
    M_pad = _round_up(M, tm)

    patches = jnp.pad(patches, ((0, M_pad - M), (0, K_pad - K)))
    patches = patches.astype(jnp.bfloat16)      # bf16 into the MXU
    w_mat = jnp.transpose(p["w"], (2, 3, 1, 0)).reshape(K, cout)   # OIHW -> (K, Cout)
    w_mat = jnp.pad(w_mat, ((0, K_pad - K), (0, C_pad - cout))).astype(jnp.bfloat16)
    bias = jnp.pad(p["b"], (0, C_pad - cout)).reshape(1, C_pad).astype(jnp.float32)

    use_bn, use_act = p["use_bn"], p["use_act"]
    outs = _conv_pass1(patches, w_mat, bias, tm=tm, m_true=M,
                       use_act=(use_act and not use_bn), emit_stats=use_bn)
    if use_bn:
        y, stats = outs
        y = _bn_act(y, stats, tm=tm, m_true=M)
    else:
        y = outs[0]

    return y[:M, :cout].reshape(N, Ho, Wo, cout)


def init_params(key, input_nc, ndf=64, n_layers=3, kw=3):
    """Deterministic synthetic parameters; shapes follow the module __init__."""
    cfgs = []
    cfgs.append((input_nc, ndf, 2, False, True))            # conv + LeakyReLU
    nf_mult = 1
    for n in range(1, n_layers):
        nf_mult_prev = nf_mult
        nf_mult = min(2 ** n, 8)
        cfgs.append((ndf * nf_mult_prev, ndf * nf_mult, 2, True, True))
    nf_mult_prev = nf_mult
    nf_mult = min(2 ** n_layers, 8)
    cfgs.append((ndf * nf_mult_prev, ndf * nf_mult, 1, True, True))
    cfgs.append((ndf * nf_mult, 1, 1, False, False))         # final conv

    params = []
    for (cin, cout, stride, use_bn, use_act) in cfgs:
        key, k1, k2 = jax.random.split(key, 3)
        w = jax.random.normal(k1, (cout, cin, kw, kw), jnp.float32) * 0.05
        b = jax.random.normal(k2, (cout,), jnp.float32) * 0.05
        params.append(dict(w=w, b=b, stride=stride, use_bn=use_bn, use_act=use_act))
    return params


def nlayer_discriminator_forward(x_nchw, params, isDetach=False, kw=3):
    """Forward pass.  `isDetach` is accepted but unused (matches reference)."""
    del isDetach
    padw = (kw - 1) // 2
    x = jnp.transpose(x_nchw, (0, 2, 3, 1))     # NCHW -> NHWC
    for p in params:
        x = _layer_forward(x, p, kw, padw)
    return jnp.transpose(x, (0, 3, 1, 2))       # NHWC -> NCHW


if __name__ == "__main__":
    key = jax.random.PRNGKey(0)
    kx, kp = jax.random.split(key)

    # Small shapes: batch=2, input_nc=4, spatial=16x16, ndf=16, n_layers=3.
    N, C, H, W = 2, 4, 16, 16
    x = jax.random.normal(kx, (N, C, H, W), jnp.float32)
    params = init_params(kp, input_nc=C, ndf=16, n_layers=3)

    fwd = jax.jit(lambda inp: nlayer_discriminator_forward(inp, params,
                                                           isDetach=True))
    out = jax.block_until_ready(fwd(x))

    # 16 -> 8 -> 4 -> 2 (three stride-2 convs), then two stride-1 convs, 1 ch.
    assert out.shape == (N, 1, 2, 2), out.shape
    assert bool(jnp.all(jnp.isfinite(out)))
    print("KERNEL_OK")
</pallas_src>

<mosaic_0001>
module attributes {stable_mosaic.version = 11 : i64} {
  func.func @_conv_pass1_kernel(%arg0: i32, %arg1: memref<128x128xbf16, #tpu.memory_space<vmem>>, %arg2: memref<128x128xbf16, #tpu.memory_space<vmem>>, %arg3: memref<1x128xf32, #tpu.memory_space<vmem>>, %arg4: memref<128x128xf32, #tpu.memory_space<vmem>>) attributes {dimension_semantics = [#tpu.dimension_semantics<parallel>], iteration_bounds = array<i64: 1>, scalar_prefetch = 0 : i64, scratch_operands = 0 : i64, tpu.core_type = #tpu.core_type<tc>, window_params = [{transform_indices = @transform_0, window_bounds = array<i64: 128, 128>}, {pipeline_mode = #tpu.pipeline_mode<synchronous>, transform_indices = @transform_1, window_bounds = array<i64: 128, 128>}, {pipeline_mode = #tpu.pipeline_mode<synchronous>, transform_indices = @transform_2, window_bounds = array<i64: 1, 128>}, {transform_indices = @transform_3, window_bounds = array<i64: 128, 128>}]} {
    %c0 = arith.constant 0 : index
    %c0_0 = arith.constant 0 : index
    %0 = vector.load %arg1[%c0, %c0_0] : memref<128x128xbf16, #tpu.memory_space<vmem>>, vector<128x128xbf16>
    %c0_1 = arith.constant 0 : index
    %c0_2 = arith.constant 0 : index
    %1 = vector.load %arg2[%c0_1, %c0_2] : memref<128x128xbf16, #tpu.memory_space<vmem>>, vector<128x128xbf16>
    %cst = arith.constant dense<0.000000e+00> : vector<128x128xf32>
    %2 = tpu.matmul %0, %1, %cst {dimension_numbers = #tpu.dot_dimension_numbers<[1], [0], [0], [1], [0, 0, 1, 1], [], []>} : vector<128x128xbf16>, vector<128x128xbf16>, vector<128x128xf32> -> vector<128x128xf32>
    %c0_3 = arith.constant 0 : index
    %c0_4 = arith.constant 0 : index
    %3 = vector.load %arg3[%c0_3, %c0_4] : memref<1x128xf32, #tpu.memory_space<vmem>>, vector<1x128xf32>
    %4 = vector.broadcast %3 : vector<1x128xf32> to vector<128x128xf32>
    %5 = arith.addf %2, %4 : vector<128x128xf32>
    %cst_5 = arith.constant 2.000000e-01 : f32
    %6 = vector.broadcast %cst_5 : f32 to vector<128x128xf32>
    %7 = arith.mulf %6, %5 : vector<128x128xf32>
    %8 = arith.maximumf %5, %7 : vector<128x128xf32>
    %c0_6 = arith.constant 0 : index
    %c0_7 = arith.constant 0 : index
    %9 = vector.load %arg4[%c0_6, %c0_7] : memref<128x128xf32, #tpu.memory_space<vmem>>, vector<128x128xf32>
    tpu.vector_store %arg4[%c0_6, %c0_7], %8 {strides = array<i32>} : memref<128x128xf32, #tpu.memory_space<vmem>>, vector<128x128xf32>,
    return
  }
  func.func @transform_0(%arg0: i32) -> (i32, i32) {
    %c0_i32 = arith.constant 0 : i32
    %c0_i32_0 = arith.constant 0 : i32
    return %arg0, %c0_i32 : i32, i32
  }
  func.func @transform_1(%arg0: i32) -> (i32, i32) {
    %c0_i32 = arith.constant 0 : i32
    %c0_i32_0 = arith.constant 0 : i32
    %c0_i32_1 = arith.constant 0 : i32
    return %c0_i32, %c0_i32_0 : i32, i32
  }
  func.func @transform_2(%arg0: i32) -> (i32, i32) {
    %c0_i32 = arith.constant 0 : i32
    %c0_i32_0 = arith.constant 0 : i32
    %c0_i32_1 = arith.constant 0 : i32
    return %c0_i32, %c0_i32_0 : i32, i32
  }
  func.func @transform_3(%arg0: i32) -> (i32, i32) {
    %c0_i32 = arith.constant 0 : i32
    %c0_i32_0 = arith.constant 0 : i32
    return %arg0, %c0_i32 : i32, i32
  }
}

module attributes {stable_mosaic.version = 11 : i64} {
  func.func @_bn_act_kernel(%arg0: i32, %arg1: memref<32x128xf32, #tpu.memory_space<vmem>>, %arg2: memref<1x8x128xf32, #tpu.memory_space<vmem>>, %arg3: memref<32x128xf32, #tpu.memory_space<vmem>>) attributes {dimension_semantics = [#tpu.dimension_semantics<parallel>], iteration_bounds = array<i64: 1>, scalar_prefetch = 0 : i64, scratch_operands = 0 : i64, tpu.core_type = #tpu.core_type<tc>, window_params = [{transform_indices = @transform_0, window_bounds = array<i64: 32, 128>}, {pipeline_mode = #tpu.pipeline_mode<synchronous>, transform_indices = @transform_1, window_bounds = array<i64: 1, 8, 128>}, {transform_indices = @transform_2, window_bounds = array<i64: 32, 128>}]} {
    %c0 = arith.constant 0 : index
    %c0_0 = arith.constant 0 : index
    %c0_1 = arith.constant 0 : index
    %0 = vector.load %arg2[%c0, %c0_0, %c0_1] : memref<1x8x128xf32, #tpu.memory_space<vmem>>, vector<1x8x128xf32>
    %cst = arith.constant dense<0.000000e+00> : vector<8x128xf32>
    %1 = vector.multi_reduction <add>, %0, %cst [0] : vector<1x8x128xf32> to vector<8x128xf32>
    %2 = vector.extract_strided_slice %1 {offsets = [0, 0], sizes = [1, 128], strides = [1, 1]} : vector<8x128xf32> to vector<1x128xf32>
    %cst_2 = arith.constant 3.125000e-02 : f32
    %3 = vector.broadcast %cst_2 : f32 to vector<1x128xf32>
    %4 = arith.mulf %2, %3 : vector<1x128xf32>
    %5 = vector.extract_strided_slice %1 {offsets = [1, 0], sizes = [1, 128], strides = [1, 1]} : vector<8x128xf32> to vector<1x128xf32>
    %cst_3 = arith.constant 3.125000e-02 : f32
    %6 = vector.broadcast %cst_3 : f32 to vector<1x128xf32>
    %7 = arith.mulf %5, %6 : vector<1x128xf32>
    %8 = arith.mulf %4, %4 : vector<1x128xf32>
    %9 = arith.subf %7, %8 : vector<1x128xf32>
    %cst_4 = arith.constant 0.000000e+00 : f32
    %10 = vector.broadcast %cst_4 : f32 to vector<1x128xf32>
    %11 = arith.maximumf %9, %10 : vector<1x128xf32>
    %cst_5 = arith.constant 9.99999974E-6 : f32
    %12 = vector.broadcast %cst_5 : f32 to vector<1x128xf32>
    %13 = arith.addf %11, %12 : vector<1x128xf32>
    %14 = math.rsqrt %13 : vector<1x128xf32>
    %c0_6 = arith.constant 0 : index
    %c0_7 = arith.constant 0 : index
    %15 = vector.load %arg1[%c0_6, %c0_7] : memref<32x128xf32, #tpu.memory_space<vmem>>, vector<32x128xf32>
    %16 = vector.broadcast %4 : vector<1x128xf32> to vector<32x128xf32>
    %17 = arith.subf %15, %16 : vector<32x128xf32>
    %18 = vector.broadcast %14 : vector<1x128xf32> to vector<32x128xf32>
    %19 = arith.mulf %17, %18 : vector<32x128xf32>
    %cst_8 = arith.constant 2.000000e-01 : f32
    %20 = vector.broadcast %cst_8 : f32 to vector<32x128xf32>
    %21 = arith.mulf %20, %19 : vector<32x128xf32>
    %22 = arith.maximumf %19, %21 : vector<32x128xf32>
    %c0_9 = arith.constant 0 : index
    %c0_10 = arith.constant 0 : index
    %23 = vector.load %arg3[%c0_9, %c0_10] : memref<32x128xf32, #tpu.memory_space<vmem>>, vector<32x128xf32>
    tpu.vector_store %arg3[%c0_9, %c0_10], %22 {strides = array<i32>} : memref<32x128xf32, #tpu.memory_space<vmem>>, vector<32x128xf32>,
    return
  }
  func.func @transform_0(%arg0: i32) -> (i32, i32) {
    %c0_i32 = arith.constant 0 : i32
    %c0_i32_0 = arith.constant 0 : i32
    return %arg0, %c0_i32 : i32, i32
  }
  func.func @transform_1(%arg0: i32) -> (i32, i32, i32) {
    %c0_i32 = arith.constant 0 : i32
    %c0_i32_0 = arith.constant 0 : i32
    %c0_i32_1 = arith.constant 0 : i32
    %c0_i32_2 = arith.constant 0 : i32
    return %c0_i32, %c0_i32_0, %c0_i32_1 : i32, i32, i32
  }
  func.func @transform_2(%arg0: i32) -> (i32, i32) {
    %c0_i32 = arith.constant 0 : i32
    %c0_i32_0 = arith.constant 0 : i32
    return %arg0, %c0_i32 : i32, i32
  }
}

module attributes {stable_mosaic.version = 11 : i64} {
  func.func @_conv_pass1_kernel(%arg0: i32, %arg1: memref<32x256xbf16, #tpu.memory_space<vmem>>, %arg2: memref<256x128xbf16, #tpu.memory_space<vmem>>, %arg3: memref<1x128xf32, #tpu.memory_space<vmem>>, %arg4: memref<32x128xf32, #tpu.memory_space<vmem>>, %arg5: memref<1x8x128xf32, #tpu.memory_space<vmem>>) attributes {dimension_semantics = [#tpu.dimension_semantics<parallel>], iteration_bounds = array<i64: 1>, scalar_prefetch = 0 : i64, scratch_operands = 0 : i64, tpu.core_type = #tpu.core_type<tc>, window_params = [{transform_indices = @transform_0, window_bounds = array<i64: 32, 256>}, {pipeline_mode = #tpu.pipeline_mode<synchronous>, transform_indices = @transform_1, window_bounds = array<i64: 256, 128>}, {pipeline_mode = #tpu.pipeline_mode<synchronous>, transform_indices = @transform_2, window_bounds = array<i64: 1, 128>}, {transform_indices = @transform_3, window_bounds = array<i64: 32, 128>}, {transform_indices = @transform_4, window_bounds = array<i64: 1, 8, 128>}]} {
    %c0 = arith.constant 0 : index
    %c0_0 = arith.constant 0 : index
    %0 = vector.load %arg1[%c0, %c0_0] : memref<32x256xbf16, #tpu.memory_space<vmem>>, vector<32x256xbf16>
    %c0_1 = arith.constant 0 : index
    %c0_2 = arith.constant 0 : index
    %1 = vector.load %arg2[%c0_1, %c0_2] : memref<256x128xbf16, #tpu.memory_space<vmem>>, vector<256x128xbf16>
    %cst = arith.constant dense<0.000000e+00> : vector<32x128xf32>
    %2 = tpu.matmul %0, %1, %cst {dimension_numbers = #tpu.dot_dimension_numbers<[1], [0], [0], [1], [0, 0, 1, 1], [], []>} : vector<32x256xbf16>, vector<256x128xbf16>, vector<32x128xf32> -> vector<32x128xf32>
    %c0_3 = arith.constant 0 : index
    %c0_4 = arith.constant 0 : index
    %3 = vector.load %arg3[%c0_3, %c0_4] : memref<1x128xf32, #tpu.memory_space<vmem>>, vector<1x128xf32>
    %4 = vector.broadcast %3 : vector<1x128xf32> to vector<32x128xf32>
    %5 = arith.addf %2, %4 : vector<32x128xf32>
    %c32_i32 = arith.constant 32 : i32
    %6 = arith.muli %arg0, %c32_i32 : i32
    %7 = tpu.iota {dimensions = array<i32: 0>} : vector<32x1xi32>
    %8 = vector.broadcast %6 : i32 to vector<32x1xi32>
    %9 = arith.addi %8, %7 : vector<32x1xi32>
    %c32_i32_5 = arith.constant 32 : i32
    %10 = vector.broadcast %c32_i32_5 : i32 to vector<32x1xi32>
    %11 = arith.cmpi slt, %9, %10 : vector<32x1xi32>
    %cst_6 = arith.constant 0.000000e+00 : f32
    %12 = vector.shape_cast %11 : vector<32x1xi1> to vector<32x1xi1>
    %13 = vector.broadcast %12 : vector<32x1xi1> to vector<32x128xi1>
    %14 = vector.broadcast %cst_6 : f32 to vector<32x128xf32>
    %15 = arith.select %13, %5, %14 : vector<32x128xi1>, vector<32x128xf32>
    %cst_7 = arith.constant dense<0.000000e+00> : vector<128xf32>
    %16 = vector.multi_reduction <add>, %15, %cst_7 [0] : vector<32x128xf32> to vector<128xf32>
    %17 = vector.shape_cast %16 : vector<128xf32> to vector<1x128xf32>
    %18 = arith.mulf %15, %15 : vector<32x128xf32>
    %cst_8 = arith.constant dense<0.000000e+00> : vector<128xf32>
    %19 = vector.multi_reduction <add>, %18, %cst_8 [0] : vector<32x128xf32> to vector<128xf32>
    %20 = vector.shape_cast %19 : vector<128xf32> to vector<1x128xf32>
    %cst_9 = arith.constant 0.000000e+00 : f32
    %21 = vector.broadcast %cst_9 : f32 to vector<6x128xf32>
    %22 = tpu.concatenate %17, %20, %21 in 0 : vector<1x128xf32>, vector<1x128xf32>, vector<6x128xf32> -> vector<8x128xf32>
    %c0_10 = arith.constant 0 : index
    %c0_11 = arith.constant 0 : index
    %c0_12 = arith.constant 0 : index
    %23 = vector.load %arg5[%c0_10, %c0_11, %c0_12] : memref<1x8x128xf32, #tpu.memory_space<vmem>>, vector<1x8x128xf32>
    %24 = vector.shape_cast %23 : vector<1x8x128xf32> to vector<8x128xf32>
    %25 = vector.shape_cast %22 : vector<8x128xf32> to vector<1x8x128xf32>
    tpu.vector_store %arg5[%c0_10, %c0_11, %c0_12], %25 {strides = array<i32>} : memref<1x8x128xf32, #tpu.memory_space<vmem>>, vector<1x8x128xf32>,
    %c0_13 = arith.constant 0 : index
    %c0_14 = arith.constant 0 : index
    %26 = vector.load %arg4[%c0_13, %c0_14] : memref<32x128xf32, #tpu.memory_space<vmem>>, vector<32x128xf32>
    tpu.vector_store %arg4[%c0_13, %c0_14], %5 {strides = array<i32>} : memref<32x128xf32, #tpu.memory_space<vmem>>, vector<32x128xf32>,
    return
  }
  func.func @transform_0(%arg0: i32) -> (i32, i32) {
    %c0_i32 = arith.constant 0 : i32
    %c0_i32_0 = arith.constant 0 : i32
    return %arg0, %c0_i32 : i32, i32
  }
  func.func @transform_1(%arg0: i32) -> (i32, i32) {
    %c0_i32 = arith.constant 0 : i32
    %c0_i32_0 = arith.constant 0 : i32
    %c0_i32_1 = arith.constant 0 : i32
    return %c0_i32, %c0_i32_0 : i32, i32
  }
  func.func @transform_2(%arg0: i32) -> (i32, i32) {
    %c0_i32 = arith.constant 0 : i32
    %c0_i32_0 = arith.constant 0 : i32
    %c0_i32_1 = arith.constant 0 : i32
    return %c0_i32, %c0_i32_0 : i32, i32
  }
  func.func @transform_3(%arg0: i32) -> (i32, i32) {
    %c0_i32 = arith.constant 0 : i32
    %c0_i32_0 = arith.constant 0 : i32
    return %arg0, %c0_i32 : i32, i32
  }
  func.func @transform_4(%arg0: i32) -> (i32, i32, i32) {
    %c0_i32 = arith.constant 0 : i32
    %c0_i32_0 = arith.constant 0 : i32
    %c0_i32_1 = arith.constant 0 : i32
    return %arg0, %c0_i32, %c0_i32_0 : i32, i32, i32
  }
}

module attributes {stable_mosaic.version = 11 : i64} {
  func.func @_conv_pass1_kernel(%arg0: i32, %arg1: memref<16x384xbf16, #tpu.memory_space<vmem>>, %arg2: memref<384x128xbf16, #tpu.memory_space<vmem>>, %arg3: memref<1x128xf32, #tpu.memory_space<vmem>>, %arg4: memref<16x128xf32, #tpu.memory_space<vmem>>, %arg5: memref<1x8x128xf32, #tpu.memory_space<vmem>>) attributes {dimension_semantics = [#tpu.dimension_semantics<parallel>], iteration_bounds = array<i64: 1>, scalar_prefetch = 0 : i64, scratch_operands = 0 : i64, tpu.core_type = #tpu.core_type<tc>, window_params = [{transform_indices = @transform_0, window_bounds = array<i64: 16, 384>}, {pipeline_mode = #tpu.pipeline_mode<synchronous>, transform_indices = @transform_1, window_bounds = array<i64: 384, 128>}, {pipeline_mode = #tpu.pipeline_mode<synchronous>, transform_indices = @transform_2, window_bounds = array<i64: 1, 128>}, {transform_indices = @transform_3, window_bounds = array<i64: 16, 128>}, {transform_indices = @transform_4, window_bounds = array<i64: 1, 8, 128>}]} {
    %c0 = arith.constant 0 : index
    %c0_0 = arith.constant 0 : index
    %0 = vector.load %arg1[%c0, %c0_0] : memref<16x384xbf16, #tpu.memory_space<vmem>>, vector<16x384xbf16>
    %c0_1 = arith.constant 0 : index
    %c0_2 = arith.constant 0 : index
    %1 = vector.load %arg2[%c0_1, %c0_2] : memref<384x128xbf16, #tpu.memory_space<vmem>>, vector<384x128xbf16>
    %cst = arith.constant dense<0.000000e+00> : vector<16x128xf32>
    %2 = tpu.matmul %0, %1, %cst {dimension_numbers = #tpu.dot_dimension_numbers<[1], [0], [0], [1], [0, 0, 1, 1], [], []>} : vector<16x384xbf16>, vector<384x128xbf16>, vector<16x128xf32> -> vector<16x128xf32>
    %c0_3 = arith.constant 0 : index
    %c0_4 = arith.constant 0 : index
    %3 = vector.load %arg3[%c0_3, %c0_4] : memref<1x128xf32, #tpu.memory_space<vmem>>, vector<1x128xf32>
    %4 = vector.broadcast %3 : vector<1x128xf32> to vector<16x128xf32>
    %5 = arith.addf %2, %4 : vector<16x128xf32>
    %c16_i32 = arith.constant 16 : i32
    %6 = arith.muli %arg0, %c16_i32 : i32
    %7 = tpu.iota {dimensions = array<i32: 0>} : vector<16x1xi32>
    %8 = vector.broadcast %6 : i32 to vector<16x1xi32>
    %9 = arith.addi %8, %7 : vector<16x1xi32>
    %c8_i32 = arith.constant 8 : i32
    %10 = vector.broadcast %c8_i32 : i32 to vector<16x1xi32>
    %11 = arith.cmpi slt, %9, %10 : vector<16x1xi32>
    %cst_5 = arith.constant 0.000000e+00 : f32
    %12 = vector.shape_cast %11 : vector<16x1xi1> to vector<16x1xi1>
    %13 = vector.broadcast %12 : vector<16x1xi1> to vector<16x128xi1>
    %14 = vector.broadcast %cst_5 : f32 to vector<16x128xf32>
    %15 = arith.select %13, %5, %14 : vector<16x128xi1>, vector<16x128xf32>
    %cst_6 = arith.constant dense<0.000000e+00> : vector<128xf32>
    %16 = vector.multi_reduction <add>, %15, %cst_6 [0] : vector<16x128xf32> to vector<128xf32>
    %17 = vector.shape_cast %16 : vector<128xf32> to vector<1x128xf32>
    %18 = arith.mulf %15, %15 : vector<16x128xf32>
    %cst_7 = arith.constant dense<0.000000e+00> : vector<128xf32>
    %19 = vector.multi_reduction <add>, %18, %cst_7 [0] : vector<16x128xf32> to vector<128xf32>
    %20 = vector.shape_cast %19 : vector<128xf32> to vector<1x128xf32>
    %cst_8 = arith.constant 0.000000e+00 : f32
    %21 = vector.broadcast %cst_8 : f32 to vector<6x128xf32>
    %22 = tpu.concatenate %17, %20, %21 in 0 : vector<1x128xf32>, vector<1x128xf32>, vector<6x128xf32> -> vector<8x128xf32>
    %c0_9 = arith.constant 0 : index
    %c0_10 = arith.constant 0 : index
    %c0_11 = arith.constant 0 : index
    %23 = vector.load %arg5[%c0_9, %c0_10, %c0_11] : memref<1x8x128xf32, #tpu.memory_space<vmem>>, vector<1x8x128xf32>
    %24 = vector.shape_cast %23 : vector<1x8x128xf32> to vector<8x128xf32>
    %25 = vector.shape_cast %22 : vector<8x128xf32> to vector<1x8x128xf32>
    tpu.vector_store %arg5[%c0_9, %c0_10, %c0_11], %25 {strides = array<i32>} : memref<1x8x128xf32, #tpu.memory_space<vmem>>, vector<1x8x128xf32>,
    %c0_12 = arith.constant 0 : index
    %c0_13 = arith.constant 0 : index
    %26 = vector.load %arg4[%c0_12, %c0_13] : memref<16x128xf32, #tpu.memory_space<vmem>>, vector<16x128xf32>
    tpu.vector_store %arg4[%c0_12, %c0_13], %5 {strides = array<i32>} : memref<16x128xf32, #tpu.memory_space<vmem>>, vector<16x128xf32>,
    return
  }
  func.func @transform_0(%arg0: i32) -> (i32, i32) {
    %c0_i32 = arith.constant 0 : i32
    %c0_i32_0 = arith.constant 0 : i32
    return %arg0, %c0_i32 : i32, i32
  }
  func.func @transform_1(%arg0: i32) -> (i32, i32) {
    %c0_i32 = arith.constant 0 : i32
    %c0_i32_0 = arith.constant 0 : i32
    %c0_i32_1 = arith.constant 0 : i32
    return %c0_i32, %c0_i32_0 : i32, i32
  }
  func.func @transform_2(%arg0: i32) -> (i32, i32) {
    %c0_i32 = arith.constant 0 : i32
    %c0_i32_0 = arith.constant 0 : i32
    %c0_i32_1 = arith.constant 0 : i32
    return %c0_i32, %c0_i32_0 : i32, i32
  }
  func.func @transform_3(%arg0: i32) -> (i32, i32) {
    %c0_i32 = arith.constant 0 : i32
    %c0_i32_0 = arith.constant 0 : i32
    return %arg0, %c0_i32 : i32, i32
  }
  func.func @transform_4(%arg0: i32) -> (i32, i32, i32) {
    %c0_i32 = arith.constant 0 : i32
    %c0_i32_0 = arith.constant 0 : i32
    %c0_i32_1 = arith.constant 0 : i32
    return %arg0, %c0_i32, %c0_i32_0 : i32, i32, i32
  }
}

module attributes {stable_mosaic.version = 11 : i64} {
  func.func @_bn_act_kernel(%arg0: i32, %arg1: memref<16x128xf32, #tpu.memory_space<vmem>>, %arg2: memref<1x8x128xf32, #tpu.memory_space<vmem>>, %arg3: memref<16x128xf32, #tpu.memory_space<vmem>>) attributes {dimension_semantics = [#tpu.dimension_semantics<parallel>], iteration_bounds = array<i64: 1>, scalar_prefetch = 0 : i64, scratch_operands = 0 : i64, tpu.core_type = #tpu.core_type<tc>, window_params = [{transform_indices = @transform_0, window_bounds = array<i64: 16, 128>}, {pipeline_mode = #tpu.pipeline_mode<synchronous>, transform_indices = @transform_1, window_bounds = array<i64: 1, 8, 128>}, {transform_indices = @transform_2, window_bounds = array<i64: 16, 128>}]} {
    %c0 = arith.constant 0 : index
    %c0_0 = arith.constant 0 : index
    %c0_1 = arith.constant 0 : index
    %0 = vector.load %arg2[%c0, %c0_0, %c0_1] : memref<1x8x128xf32, #tpu.memory_space<vmem>>, vector<1x8x128xf32>
    %cst = arith.constant dense<0.000000e+00> : vector<8x128xf32>
    %1 = vector.multi_reduction <add>, %0, %cst [0] : vector<1x8x128xf32> to vector<8x128xf32>
    %2 = vector.extract_strided_slice %1 {offsets = [0, 0], sizes = [1, 128], strides = [1, 1]} : vector<8x128xf32> to vector<1x128xf32>
    %cst_2 = arith.constant 1.250000e-01 : f32
    %3 = vector.broadcast %cst_2 : f32 to vector<1x128xf32>
    %4 = arith.mulf %2, %3 : vector<1x128xf32>
    %5 = vector.extract_strided_slice %1 {offsets = [1, 0], sizes = [1, 128], strides = [1, 1]} : vector<8x128xf32> to vector<1x128xf32>
    %cst_3 = arith.constant 1.250000e-01 : f32
    %6 = vector.broadcast %cst_3 : f32 to vector<1x128xf32>
    %7 = arith.mulf %5, %6 : vector<1x128xf32>
    %8 = arith.mulf %4, %4 : vector<1x128xf32>
    %9 = arith.subf %7, %8 : vector<1x128xf32>
    %cst_4 = arith.constant 0.000000e+00 : f32
    %10 = vector.broadcast %cst_4 : f32 to vector<1x128xf32>
    %11 = arith.maximumf %9, %10 : vector<1x128xf32>
    %cst_5 = arith.constant 9.99999974E-6 : f32
    %12 = vector.broadcast %cst_5 : f32 to vector<1x128xf32>
    %13 = arith.addf %11, %12 : vector<1x128xf32>
    %14 = math.rsqrt %13 : vector<1x128xf32>
    %c0_6 = arith.constant 0 : index
    %c0_7 = arith.constant 0 : index
    %15 = vector.load %arg1[%c0_6, %c0_7] : memref<16x128xf32, #tpu.memory_space<vmem>>, vector<16x128xf32>
    %16 = vector.broadcast %4 : vector<1x128xf32> to vector<16x128xf32>
    %17 = arith.subf %15, %16 : vector<16x128xf32>
    %18 = vector.broadcast %14 : vector<1x128xf32> to vector<16x128xf32>
    %19 = arith.mulf %17, %18 : vector<16x128xf32>
    %cst_8 = arith.constant 2.000000e-01 : f32
    %20 = vector.broadcast %cst_8 : f32 to vector<16x128xf32>
    %21 = arith.mulf %20, %19 : vector<16x128xf32>
    %22 = arith.maximumf %19, %21 : vector<16x128xf32>
    %c0_9 = arith.constant 0 : index
    %c0_10 = arith.constant 0 : index
    %23 = vector.load %arg3[%c0_9, %c0_10] : memref<16x128xf32, #tpu.memory_space<vmem>>, vector<16x128xf32>
    tpu.vector_store %arg3[%c0_9, %c0_10], %22 {strides = array<i32>} : memref<16x128xf32, #tpu.memory_space<vmem>>, vector<16x128xf32>,
    return
  }
  func.func @transform_0(%arg0: i32) -> (i32, i32) {
    %c0_i32 = arith.constant 0 : i32
    %c0_i32_0 = arith.constant 0 : i32
    return %arg0, %c0_i32 : i32, i32
  }
  func.func @transform_1(%arg0: i32) -> (i32, i32, i32) {
    %c0_i32 = arith.constant 0 : i32
    %c0_i32_0 = arith.constant 0 : i32
    %c0_i32_1 = arith.constant 0 : i32
    %c0_i32_2 = arith.constant 0 : i32
    return %c0_i32, %c0_i32_0, %c0_i32_1 : i32, i32, i32
  }
  func.func @transform_2(%arg0: i32) -> (i32, i32) {
    %c0_i32 = arith.constant 0 : i32
    %c0_i32_0 = arith.constant 0 : i32
    return %arg0, %c0_i32 : i32, i32
  }
}

module attributes {stable_mosaic.version = 11 : i64} {
  func.func @_conv_pass1_kernel(%arg0: i32, %arg1: memref<16x640xbf16, #tpu.memory_space<vmem>>, %arg2: memref<640x128xbf16, #tpu.memory_space<vmem>>, %arg3: memref<1x128xf32, #tpu.memory_space<vmem>>, %arg4: memref<16x128xf32, #tpu.memory_space<vmem>>, %arg5: memref<1x8x128xf32, #tpu.memory_space<vmem>>) attributes {dimension_semantics = [#tpu.dimension_semantics<parallel>], iteration_bounds = array<i64: 1>, scalar_prefetch = 0 : i64, scratch_operands = 0 : i64, tpu.core_type = #tpu.core_type<tc>, window_params = [{transform_indices = @transform_0, window_bounds = array<i64: 16, 640>}, {pipeline_mode = #tpu.pipeline_mode<synchronous>, transform_indices = @transform_1, window_bounds = array<i64: 640, 128>}, {pipeline_mode = #tpu.pipeline_mode<synchronous>, transform_indices = @transform_2, window_bounds = array<i64: 1, 128>}, {transform_indices = @transform_3, window_bounds = array<i64: 16, 128>}, {transform_indices = @transform_4, window_bounds = array<i64: 1, 8, 128>}]} {
    %c0 = arith.constant 0 : index
    %c0_0 = arith.constant 0 : index
    %0 = vector.load %arg1[%c0, %c0_0] : memref<16x640xbf16, #tpu.memory_space<vmem>>, vector<16x640xbf16>
    %c0_1 = arith.constant 0 : index
    %c0_2 = arith.constant 0 : index
    %1 = vector.load %arg2[%c0_1, %c0_2] : memref<640x128xbf16, #tpu.memory_space<vmem>>, vector<640x128xbf16>
    %cst = arith.constant dense<0.000000e+00> : vector<16x128xf32>
    %2 = tpu.matmul %0, %1, %cst {dimension_numbers = #tpu.dot_dimension_numbers<[1], [0], [0], [1], [0, 0, 1, 1], [], []>} : vector<16x640xbf16>, vector<640x128xbf16>, vector<16x128xf32> -> vector<16x128xf32>
    %c0_3 = arith.constant 0 : index
    %c0_4 = arith.constant 0 : index
    %3 = vector.load %arg3[%c0_3, %c0_4] : memref<1x128xf32, #tpu.memory_space<vmem>>, vector<1x128xf32>
    %4 = vector.broadcast %3 : vector<1x128xf32> to vector<16x128xf32>
    %5 = arith.addf %2, %4 : vector<16x128xf32>
    %c16_i32 = arith.constant 16 : i32
    %6 = arith.muli %arg0, %c16_i32 : i32
    %7 = tpu.iota {dimensions = array<i32: 0>} : vector<16x1xi32>
    %8 = vector.broadcast %6 : i32 to vector<16x1xi32>
    %9 = arith.addi %8, %7 : vector<16x1xi32>
    %c8_i32 = arith.constant 8 : i32
    %10 = vector.broadcast %c8_i32 : i32 to vector<16x1xi32>
    %11 = arith.cmpi slt, %9, %10 : vector<16x1xi32>
    %cst_5 = arith.constant 0.000000e+00 : f32
    %12 = vector.shape_cast %11 : vector<16x1xi1> to vector<16x1xi1>
    %13 = vector.broadcast %12 : vector<16x1xi1> to vector<16x128xi1>
    %14 = vector.broadcast %cst_5 : f32 to vector<16x128xf32>
    %15 = arith.select %13, %5, %14 : vector<16x128xi1>, vector<16x128xf32>
    %cst_6 = arith.constant dense<0.000000e+00> : vector<128xf32>
    %16 = vector.multi_reduction <add>, %15, %cst_6 [0] : vector<16x128xf32> to vector<128xf32>
    %17 = vector.shape_cast %16 : vector<128xf32> to vector<1x128xf32>
    %18 = arith.mulf %15, %15 : vector<16x128xf32>
    %cst_7 = arith.constant dense<0.000000e+00> : vector<128xf32>
    %19 = vector.multi_reduction <add>, %18, %cst_7 [0] : vector<16x128xf32> to vector<128xf32>
    %20 = vector.shape_cast %19 : vector<128xf32> to vector<1x128xf32>
    %cst_8 = arith.constant 0.000000e+00 : f32
    %21 = vector.broadcast %cst_8 : f32 to vector<6x128xf32>
    %22 = tpu.concatenate %17, %20, %21 in 0 : vector<1x128xf32>, vector<1x128xf32>, vector<6x128xf32> -> vector<8x128xf32>
    %c0_9 = arith.constant 0 : index
    %c0_10 = arith.constant 0 : index
    %c0_11 = arith.constant 0 : index
    %23 = vector.load %arg5[%c0_9, %c0_10, %c0_11] : memref<1x8x128xf32, #tpu.memory_space<vmem>>, vector<1x8x128xf32>
    %24 = vector.shape_cast %23 : vector<1x8x128xf32> to vector<8x128xf32>
    %25 = vector.shape_cast %22 : vector<8x128xf32> to vector<1x8x128xf32>
    tpu.vector_store %arg5[%c0_9, %c0_10, %c0_11], %25 {strides = array<i32>} : memref<1x8x128xf32, #tpu.memory_space<vmem>>, vector<1x8x128xf32>,
    %c0_12 = arith.constant 0 : index
    %c0_13 = arith.constant 0 : index
    %26 = vector.load %arg4[%c0_12, %c0_13] : memref<16x128xf32, #tpu.memory_space<vmem>>, vector<16x128xf32>
    tpu.vector_store %arg4[%c0_12, %c0_13], %5 {strides = array<i32>} : memref<16x128xf32, #tpu.memory_space<vmem>>, vector<16x128xf32>,
    return
  }
  func.func @transform_0(%arg0: i32) -> (i32, i32) {
    %c0_i32 = arith.constant 0 : i32
    %c0_i32_0 = arith.constant 0 : i32
    return %arg0, %c0_i32 : i32, i32
  }
  func.func @transform_1(%arg0: i32) -> (i32, i32) {
    %c0_i32 = arith.constant 0 : i32
    %c0_i32_0 = arith.constant 0 : i32
    %c0_i32_1 = arith.constant 0 : i32
    return %c0_i32, %c0_i32_0 : i32, i32
  }
  func.func @transform_2(%arg0: i32) -> (i32, i32) {
    %c0_i32 = arith.constant 0 : i32
    %c0_i32_0 = arith.constant 0 : i32
    %c0_i32_1 = arith.constant 0 : i32
    return %c0_i32, %c0_i32_0 : i32, i32
  }
  func.func @transform_3(%arg0: i32) -> (i32, i32) {
    %c0_i32 = arith.constant 0 : i32
    %c0_i32_0 = arith.constant 0 : i32
    return %arg0, %c0_i32 : i32, i32
  }
  func.func @transform_4(%arg0: i32) -> (i32, i32, i32) {
    %c0_i32 = arith.constant 0 : i32
    %c0_i32_0 = arith.constant 0 : i32
    %c0_i32_1 = arith.constant 0 : i32
    return %arg0, %c0_i32, %c0_i32_0 : i32, i32, i32
  }
}

module attributes {stable_mosaic.version = 11 : i64} {
  func.func @_conv_pass1_kernel(%arg0: i32, %arg1: memref<16x1152xbf16, #tpu.memory_space<vmem>>, %arg2: memref<1152x128xbf16, #tpu.memory_space<vmem>>, %arg3: memref<1x128xf32, #tpu.memory_space<vmem>>, %arg4: memref<16x128xf32, #tpu.memory_space<vmem>>) attributes {dimension_semantics = [#tpu.dimension_semantics<parallel>], iteration_bounds = array<i64: 1>, scalar_prefetch = 0 : i64, scratch_operands = 0 : i64, tpu.core_type = #tpu.core_type<tc>, window_params = [{transform_indices = @transform_0, window_bounds = array<i64: 16, 1152>}, {pipeline_mode = #tpu.pipeline_mode<synchronous>, transform_indices = @transform_1, window_bounds = array<i64: 1152, 128>}, {pipeline_mode = #tpu.pipeline_mode<synchronous>, transform_indices = @transform_2, window_bounds = array<i64: 1, 128>}, {transform_indices = @transform_3, window_bounds = array<i64: 16, 128>}]} {
    %c0 = arith.constant 0 : index
    %c0_0 = arith.constant 0 : index
    %0 = vector.load %arg1[%c0, %c0_0] : memref<16x1152xbf16, #tpu.memory_space<vmem>>, vector<16x1152xbf16>
    %c0_1 = arith.constant 0 : index
    %c0_2 = arith.constant 0 : index
    %1 = vector.load %arg2[%c0_1, %c0_2] : memref<1152x128xbf16, #tpu.memory_space<vmem>>, vector<1152x128xbf16>
    %cst = arith.constant dense<0.000000e+00> : vector<16x128xf32>
    %2 = tpu.matmul %0, %1, %cst {dimension_numbers = #tpu.dot_dimension_numbers<[1], [0], [0], [1], [0, 0, 1, 1], [], []>} : vector<16x1152xbf16>, vector<1152x128xbf16>, vector<16x128xf32> -> vector<16x128xf32>
    %c0_3 = arith.constant 0 : index
    %c0_4 = arith.constant 0 : index
    %3 = vector.load %arg3[%c0_3, %c0_4] : memref<1x128xf32, #tpu.memory_space<vmem>>, vector<1x128xf32>
    %4 = vector.broadcast %3 : vector<1x128xf32> to vector<16x128xf32>
    %5 = arith.addf %2, %4 : vector<16x128xf32>
    %c0_5 = arith.constant 0 : index
    %c0_6 = arith.constant 0 : index
    %6 = vector.load %arg4[%c0_5, %c0_6] : memref<16x128xf32, #tpu.memory_space<vmem>>, vector<16x128xf32>
    tpu.vector_store %arg4[%c0_5, %c0_6], %5 {strides = array<i32>} : memref<16x128xf32, #tpu.memory_space<vmem>>, vector<16x128xf32>,
    return
  }
  func.func @transform_0(%arg0: i32) -> (i32, i32) {
    %c0_i32 = arith.constant 0 : i32
    %c0_i32_0 = arith.constant 0 : i32
    return %arg0, %c0_i32 : i32, i32
  }
  func.func @transform_1(%arg0: i32) -> (i32, i32) {
    %c0_i32 = arith.constant 0 : i32
    %c0_i32_0 = arith.constant 0 : i32
    %c0_i32_1 = arith.constant 0 : i32
    return %c0_i32, %c0_i32_0 : i32, i32
  }
  func.func @transform_2(%arg0: i32) -> (i32, i32) {
    %c0_i32 = arith.constant 0 : i32
    %c0_i32_0 = arith.constant 0 : i32
    %c0_i32_1 = arith.constant 0 : i32
    return %c0_i32, %c0_i32_0 : i32, i32
  }
  func.func @transform_3(%arg0: i32) -> (i32, i32) {
    %c0_i32 = arith.constant 0 : i32
    %c0_i32_0 = arith.constant 0 : i32
    return %arg0, %c0_i32 : i32, i32
  }
}

</mosaic_0001>

<bundles_post_ra>
// kernel: _lambda_.8
= control target key start
LH: loop header
LB: loop body
LE: loop exit
PB: predicated region body
PF: predicated region fallthrough
CT: control target
= control target key end

     0   :  { %s533_s1 = inlined_call_operand.vmem [shape: bf16[128,128], index: 1, kind: input, shape index: {}]   ;;  %s534_s0 = inlined_call_operand.vmem [shape: bf16[128,128], index: 0, kind: input, shape index: {}]   ;;  %s535_s2 = inlined_call_operand.vmem [shape: f32[1,128], index: 2, kind: input, shape index: {}]   ;;  %s536_s3 = inlined_call_operand.vmem [shape: f32[128,128], index: 3, kind: output, shape index: {}]  }
   0x1   :  { %v380_v0 = vld [vmem:[%s533_s1 + $0x38] sm:$0xff]   ;;  %v381_v1 = vld [vmem:[%s533_s1 + $0x30] sm:$0xff]   ;;  %v382_v2 = vld [vmem:[%s533_s1 + $0x28] sm:$0xff]  }
   0x2   :  { %332 = vmatprep.subr.bf16.mxu0 %v380_v0  ;;  %364 = vmatprep.subr.bf16.mxu1 %v380_v0  ;;  %v383_v3 = vld [vmem:[%s533_s1 + $0x20] sm:$0xff]   ;;  %v384_v6 = vld [vmem:[%s533_s1 + $0x18] sm:$0xff]   ;;  %v385_v7 = vld [vmem:[%s533_s1 + $0x10] sm:$0xff]  }
   0x3   :  { %333 = vmatpush3.bf16.msra.mxu0 %v380_v0  ;;  %372 = vmatpush3.bf16.msra.mxu1 %v380_v0  ;;  %v388_v4 = vld [vmem:[%s534_s0] sm:$0xff]   ;;  %v386_v8 = vld [vmem:[%s533_s1 + $0x8] sm:$0xff]   ;;  %v392_v12 = vld [vmem:[%s534_s0 + $0x10] sm:$0xff]  }
   0x4   :  { %334 = vmatprep.subr.bf16.mxu0 %v381_v1  ;;  %365 = vmatprep.subr.bf16.mxu1 %v381_v1  ;;  %v389_v5 = vld [vmem:[%s534_s0 + $0x20] sm:$0xff]   ;;  %v390_v10 = vld [vmem:[%s534_s0 + $0x8] sm:$0xff]   ;;  %v393_v13 = vld [vmem:[%s534_s0 + $0x30] sm:$0xff]  }
   0x5   :  { %348 = vmatprep.mubr.bf16.mxu0 %v388_v4  ;;  %356 = vmatprep.mubr.bf16.mxu1 %v389_v5  ;;  %v387_v9 = vld [vmem:[%s533_s1] sm:$0xff]   ;;  %v391_v11 = vld [vmem:[%s534_s0 + $0x28] sm:$0xff]   ;;  %v394_v14 = vld [vmem:[%s534_s0 + $0x18] sm:$0xff]  }
   0x6   :  { %v395_v15 = vld [vmem:[%s534_s0 + $0x38] sm:$0xff]   ;;  %v467_v16 = vld [vmem:[%s535_s2] ss:$0 sm:$0xff] }
   0x7   :  { %335 = vmatpush3.bf16.msra.mxu0 %v381_v1  ;;  %373 = vmatpush3.bf16.msra.mxu1 %v381_v1 }
   0x8   :  { %336 = vmatprep.subr.bf16.mxu0 %v382_v2  ;;  %366 = vmatprep.subr.bf16.mxu1 %v382_v2 }
   0xb   :  { %337 = vmatpush3.bf16.msra.mxu0 %v382_v2  ;;  %374 = vmatpush3.bf16.msra.mxu1 %v382_v2 }
   0xc   :  { %338 = vmatprep.subr.bf16.mxu0 %v383_v3  ;;  %367 = vmatprep.subr.bf16.mxu1 %v383_v3 }
   0xf   :  { %339 = vmatpush3.bf16.msra.mxu0 %v383_v3  ;;  %375 = vmatpush3.bf16.msra.mxu1 %v383_v3 }
  0x10   :  { %340 = vmatprep.subr.bf16.mxu0 %v384_v6  ;;  %368 = vmatprep.subr.bf16.mxu1 %v384_v6 }
  0x13   :  { %341 = vmatpush3.bf16.msra.mxu0 %v384_v6  ;;  %376 = vmatpush3.bf16.msra.mxu1 %v384_v6 }
  0x14   :  { %342 = vmatprep.subr.bf16.mxu0 %v385_v7  ;;  %369 = vmatprep.subr.bf16.mxu1 %v385_v7 }
  0x17   :  { %343 = vmatpush3.bf16.msra.mxu0 %v385_v7  ;;  %377 = vmatpush3.bf16.msra.mxu1 %v385_v7 }
  0x18   :  { %344 = vmatprep.subr.bf16.mxu0 %v386_v8  ;;  %370 = vmatprep.subr.bf16.mxu1 %v386_v8 }
  0x1b   :  { %345 = vmatpush3.bf16.msra.mxu0 %v386_v8  ;;  %378 = vmatpush3.bf16.msra.mxu1 %v386_v8 }
  0x1c   :  { %346 = vmatprep.subr.bf16.mxu0 %v387_v9  ;;  %371 = vmatprep.subr.bf16.mxu1 %v387_v9 }
  0x1f   :  { %347 = vmatpush3.bf16.msra.mxu0 %v387_v9  ;;  %379 = vmatpush3.bf16.msra.mxu1 %v387_v9 }
  0x22   :  { %349 = vmatmul.mubr.bf16.vlgmr.msra.gmra.mxu0 %v390_v10  ;;  %357 = vmatmul.mubr.bf16.vlgmr.msra.gmra.mxu1 %v391_v11 }
  0x23   :  { %352 = vmatprep.mubr.bf16.mxu0 %v392_v12  ;;  %360 = vmatprep.mubr.bf16.mxu1 %v393_v13 }
  0x2a   :  { %353 = vmatmul.mubr.bf16.gmra.mxu0 %v394_v14  ;;  %361 = vmatmul.mubr.bf16.gmra.mxu1 %v395_v15 }
  0xe2   :  { %v350_v17 = vpop.f32.mrf.mxu0  ;;  %v358_v18 = vpop.f32.mrf.mxu1 }
  0xe3   :  { %v193_v19 = vadd.f32 %v350_v17, %v467_v16  ;;  %v225_v20 = vadd.f32 %v358_v18, %v467_v16 }
  0xe4   :  { %v184_v21 = vpop.f32.mrf.mxu0  ;;  %v216_v22 = vpop.f32.mrf.mxu1 }
  0xe5   :  { %v249_v23 = vmul.f32 0.2, %v193_v19  ;;  %v257_v24 = vmul.f32 0.2, %v225_v20  ;;  %v185_v25 = vadd.f32 %v467_v16, %v184_v21  ;;  %v217_v26 = vadd.f32 %v467_v16, %v216_v22 }
  0xe6   :  { %v351_v27 = vpop.f32.mrf.mxu0  ;;  %v359_v28 = vpop.f32.mrf.mxu1 }
  0xe7   :  { %v265_v29 = vmax.f32 %v193_v19, %v249_v23  ;;  %v273_v30 = vmax.f32 %v225_v20, %v257_v24  ;;  %v247_v31 = vmul.f32 0.2, %v185_v25  ;;  %v255_v32 = vmul.f32 0.2, %v217_v26 }
  0xe8   :  { %v196_v33 = vadd.f32 %v351_v27, %v467_v16  ;;  %v228_v34 = vadd.f32 %v359_v28, %v467_v16  ;;  %v187_v35 = vpop.f32.mrf.mxu0  ;;  %v219_v36 = vpop.f32.mrf.mxu1 }
  0xe9   :  { %281 = vst [vmem:[%s536_s3 + $0x10] sm:$0xff] %v265_v29  ;;  %289 = vst [vmem:[%s536_s3 + $0x50] sm:$0xff] %v273_v30  ;;  %v263_v37 = vmax.f32 %v185_v25, %v247_v31  ;;  %v271_v38 = vmax.f32 %v217_v26, %v255_v32  ;;  %v188_v39 = vadd.f32 %v467_v16, %v187_v35 }
  0xea   :  { %v220_v40 = vadd.f32 %v467_v16, %v219_v36  ;;  %v250_v41 = vmul.f32 0.2, %v196_v33  ;;  %v258_v42 = vmul.f32 0.2, %v228_v34  ;;  %v354_v43 = vpop.f32.mrf.mxu0  ;;  %v362_v44 = vpop.f32.mrf.mxu1 }
  0xeb   :  { %279 = vst [vmem:[%s536_s3] sm:$0xff] %v263_v37  ;;  %287 = vst [vmem:[%s536_s3 + $0x40] sm:$0xff] %v271_v38  ;;  %v248_v45 = vmul.f32 0.2, %v188_v39  ;;  %v209_v47 = vadd.f32 %v354_v43, %v467_v16  ;;  %v241_v48 = vadd.f32 %v362_v44, %v467_v16 }
  0xec   :  { %v256_v46 = vmul.f32 0.2, %v220_v40  ;;  %v266_v49 = vmax.f32 %v196_v33, %v250_v41  ;;  %v274_v50 = vmax.f32 %v228_v34, %v258_v42  ;;  %v200_v51 = vpop.f32.mrf.mxu0  ;;  %v232_v52 = vpop.f32.mrf.mxu1 }
  0xed   :  { %v264_v53 = vmax.f32 %v188_v39, %v248_v45  ;;  %v253_v55 = vmul.f32 0.2, %v209_v47  ;;  %v261_v56 = vmul.f32 0.2, %v241_v48  ;;  %v201_v57 = vadd.f32 %v467_v16, %v200_v51 }
  0xee   :  { %v272_v54 = vmax.f32 %v220_v40, %v256_v46  ;;  %282 = vst [vmem:[%s536_s3 + $0x18] sm:$0xff] %v266_v49  ;;  %290 = vst [vmem:[%s536_s3 + $0x58] sm:$0xff] %v274_v50  ;;  %v233_v58 = vadd.f32 %v467_v16, %v232_v52  ;;  %v355_v59 = vpop.f32.mrf.mxu0  ;;  %v363_v60 = vpop.f32.mrf.mxu1 }
  0xef   :  { %280 = vst [vmem:[%s536_s3 + $0x8] sm:$0xff] %v264_v53  ;;  %v269_v61 = vmax.f32 %v209_v47, %v253_v55  ;;  %v277_v62 = vmax.f32 %v241_v48, %v261_v56  ;;  %v212_v63 = vadd.f32 %v355_v59, %v467_v16  ;;  %v244_v0 = vadd.f32 %v363_v60, %v467_v16 }
  0xf0   :  { %288 = vst [vmem:[%s536_s3 + $0x48] sm:$0xff] %v272_v54  ;;  %v251_v1 = vmul.f32 0.2, %v201_v57  ;;  %v259_v2 = vmul.f32 0.2, %v233_v58  ;;  %v203_v3 = vpop.f32.mrf.mxu0  ;;  %v235_v4 = vpop.f32.mrf.mxu1 }
  0xf1   :  { %285 = vst [vmem:[%s536_s3 + $0x30] sm:$0xff] %v269_v61  ;;  %293 = vst [vmem:[%s536_s3 + $0x70] sm:$0xff] %v277_v62  ;;  %v254_v5 = vmul.f32 0.2, %v212_v63  ;;  %v262_v6 = vmul.f32 0.2, %v244_v0  ;;  %v204_v7 = vadd.f32 %v467_v16, %v203_v3  ;;  %v236_v8 = vadd.f32 %v467_v16, %v235_v4 }
  0xf2   :  { %v267_v9 = vmax.f32 %v201_v57, %v251_v1  ;;  %v275_v10 = vmax.f32 %v233_v58, %v259_v2 }
  0xf3   :  { %v270_v11 = vmax.f32 %v212_v63, %v254_v5  ;;  %v278_v12 = vmax.f32 %v244_v0, %v262_v6  ;;  %v252_v13 = vmul.f32 0.2, %v204_v7  ;;  %v260_v14 = vmul.f32 0.2, %v236_v8 }
  0xf4   :  { %283 = vst [vmem:[%s536_s3 + $0x20] sm:$0xff] %v267_v9  ;;  %291 = vst [vmem:[%s536_s3 + $0x60] sm:$0xff] %v275_v10 }
  0xf5   :  { %286 = vst [vmem:[%s536_s3 + $0x38] sm:$0xff] %v270_v11  ;;  %294 = vst [vmem:[%s536_s3 + $0x78] sm:$0xff] %v278_v12  ;;  %v268_v15 = vmax.f32 %v204_v7, %v252_v13  ;;  %v276_v16 = vmax.f32 %v236_v8, %v260_v14 }
  0xf7   :  { %284 = vst [vmem:[%s536_s3 + $0x28] sm:$0xff] %v268_v15  ;;  %292 = vst [vmem:[%s536_s3 + $0x68] sm:$0xff] %v276_v16 }

// kernel: _lambda_.10
= control target key start
LH: loop header
LB: loop body
LE: loop exit
PB: predicated region body
PF: predicated region fallthrough
CT: control target
= control target key end

     0   :  { %v26_v6 = vlaneseq  ;;  %s102_s1 = inlined_call_operand.vmem [shape: f32[1,8,128], index: 1, kind: input, shape index: {}]   ;;  %s103_s0 = inlined_call_operand.vmem [shape: f32[32,128], index: 0, kind: input, shape index: {}]   ;;  %s104_s2 = inlined_call_operand.vmem [shape: f32[32,128], index: 2, kind: output, shape index: {}]  }
   0x1   :  { %v11_v0 = vld [vmem:[%s102_s1] sm:$0xff]  ;;  %v23_v12 = vld [vmem:[%s103_s0 + $0x8] sm:$0xff]  ;;  %v24_v13 = vld [vmem:[%s103_s0 + $0x10] sm:$0xff] }
   0x2   :  { %v13_v1 = vmul.f32 0.03125, %v11_v0  ;;  %v27_v8 = vshrl.u32 %v26_v6, 7  ;;  %v22_v10 = vld [vmem:[%s103_s0] sm:$0xff]  ;;  %v25_v14 = vld [vmem:[%s103_s0 + $0x18] sm:$0xff] }
   0x4   :  { %v14_v2 = vmul.f32 %v13_v1, %v13_v1  ;;  %v28_v9 = vsub.s32 0, %v27_v8  ;;  %v36_v15 = vsub.s32 1, %v27_v8 }
   0x6   :  { %v16_v3 = vrot.slane %v14_v2, 7  ;;  %v29_v11 = vrot.slane %v13_v1, %v28_v9 }
   0x8   :  { %v18_v4 = vsub.f32 %v13_v1, %v16_v3  ;;  %v30_v16 = vsub.f32 %v22_v10, %v29_v11  ;;  %v31_v17 = vsub.f32 %v23_v12, %v29_v11  ;;  %v32_v18 = vsub.f32 %v24_v13, %v29_v11 }
   0x9   :  { %v33_v19 = vsub.f32 %v25_v14, %v29_v11 }
   0xa   :  { %v19_v5 = vmax.f32 %v18_v4, 0.0 }
   0xc   :  { %v20_v7 = vadd.f32 1e-05, %v19_v5 }
   0xe   :  { %58 = vrsqrt.f32 %v20_v7 }
  0x1b   :  { %v59_v20 = vpop.eup %58 }
  0x1c   :  { %v37_v21 = vrot.slane %v59_v20, %v36_v15 }
  0x1e   :  { %v38_v22 = vmul.f32 %v37_v21, %v30_v16  ;;  %v39_v23 = vmul.f32 %v37_v21, %v31_v17  ;;  %v40_v24 = vmul.f32 %v37_v21, %v32_v18  ;;  %v41_v25 = vmul.f32 %v37_v21, %v33_v19 }
  0x20   :  { %v42_v26 = vmul.f32 0.2, %v38_v22  ;;  %v43_v27 = vmul.f32 0.2, %v39_v23  ;;  %v44_v28 = vmul.f32 0.2, %v40_v24 }
  0x21   :  { %v45_v29 = vmul.f32 0.2, %v41_v25 }
  0x22   :  { %v46_v30 = vmax.f32 %v38_v22, %v42_v26  ;;  %v47_v31 = vmax.f32 %v39_v23, %v43_v27  ;;  %v48_v32 = vmax.f32 %v40_v24, %v44_v28 }
  0x23   :  { %v49_v33 = vmax.f32 %v41_v25, %v45_v29 }
  0x24   :  { %50 = vst [vmem:[%s104_s2] sm:$0xff] %v46_v30  ;;  %51 = vst [vmem:[%s104_s2 + $0x8] sm:$0xff] %v47_v31 }
  0x25   :  { %52 = vst [vmem:[%s104_s2 + $0x10] sm:$0xff] %v48_v32  ;;  %53 = vst [vmem:[%s104_s2 + $0x18] sm:$0xff] %v49_v33 }

// kernel: _lambda_.9
= control target key start
LH: loop header
LB: loop body
LE: loop exit
PB: predicated region body
PF: predicated region fallthrough
CT: control target
= control target key end

     0   :  { %vm274_vm0 = vcmask 1040384   ;;  %vm276_vm1 = vcmask 1041408   ;;  %s481_s1 = inlined_call_operand.vmem [shape: bf16[256,128], index: 1, kind: input, shape index: {}]   ;;  %s482_s0 = inlined_call_operand.vmem [shape: bf16[32,256], index: 0, kind: input, shape index: {}]   ;;  %s483_s2 = inlined_call_operand.vmem [shape: f32[1,128], index: 2, kind: input, shape index: {}]   ;;  %s484_s3 = inlined_call_operand.vmem [shape: f32[32,128], index: 3, kind: output, shape index: {0}]   ;;  %s485_s4 = inlined_call_operand.vmem [shape: f32[1,8,128], index: 4, kind: output, shape index: {1}]  }
   0x1   :  { %v356_v0 = vld [vmem:[%s481_s1 + $0x78] sm:$0xff]   ;;  %v358_v2 = vld [vmem:[%s481_s1 + $0x70] sm:$0xff]   ;;  %v360_v4 = vld [vmem:[%s481_s1 + $0x68] sm:$0xff]  }
   0x2   :  { %v357_v1 = vld [vmem:[%s481_s1 + $0x38] sm:$0xff]   ;;  %312 = vmatprep.subr.bf16.mxu0 %v356_v0  ;;  %340 = vmatprep.subr.bf16.mxu1 %v356_v0  ;;  %v359_v3 = vld [vmem:[%s481_s1 + $0x30] sm:$0xff]   ;;  %v361_v5 = vld [vmem:[%s481_s1 + $0x28] sm:$0xff]  }
   0x3   :  { %313 = vmatpush3.bf16.msra.mxu0 %v357_v1  ;;  %348 = vmatpush3.bf16.msra.mxu1 %v357_v1  ;;  %v362_v6 = vld [vmem:[%s481_s1 + $0x60] sm:$0xff]   ;;  %v364_v8 = vld [vmem:[%s481_s1 + $0x58] sm:$0xff]   ;;  %v366_v10 = vld [vmem:[%s481_s1 + $0x50] sm:$0xff]  }
   0x4   :  { %314 = vmatprep.subr.bf16.mxu0 %v358_v2  ;;  %341 = vmatprep.subr.bf16.mxu1 %v358_v2  ;;  %v363_v7 = vld [vmem:[%s481_s1 + $0x20] sm:$0xff]   ;;  %v365_v9 = vld [vmem:[%s481_s1 + $0x18] sm:$0xff]   ;;  %v367_v13 = vld [vmem:[%s481_s1 + $0x10] sm:$0xff]  }
   0x5   :  { %v374_v11 = vld [vmem:[%s482_s0 + $0x4] ss:$8 sps:$4 sm:$0xff]   ;;  %v377_v12 = vld [vmem:[%s482_s0 + $0x14] ss:$8 sps:$4 sm:$0xff]   ;;  %v372_v18 = vld [vmem:[%s482_s0] ss:$8 sps:$4 sm:$0xff]  }
   0x6   :  { %v368_v14 = vld [vmem:[%s481_s1 + $0x48] sm:$0xff]   ;;  %208 = vmatprep.mubr.bf16.mxu0 %v374_v11  ;;  %216 = vmatprep.mubr.bf16.mxu1 %v377_v12  ;;  %v370_v16 = vld [vmem:[%s481_s1 + $0x40] sm:$0xff]   ;;  %v375_v19 = vld [vmem:[%s482_s0 + $0x10] ss:$8 sps:$4 sm:$0xff]  }
   0x7   :  { %315 = vmatpush3.bf16.msra.mxu0 %v359_v3  ;;  %349 = vmatpush3.bf16.msra.mxu1 %v359_v3  ;;  %v369_v15 = vld [vmem:[%s481_s1 + $0x8] sm:$0xff]   ;;  %v371_v17 = vld [vmem:[%s481_s1] sm:$0xff]  }
   0x8   :  { %316 = vmatprep.subr.bf16.mxu0 %v360_v4  ;;  %342 = vmatprep.subr.bf16.mxu1 %v360_v4  ;;  %v291_v22 = vld [vmem:[%s483_s2] ss:$0 sm:$0xff] }
   0xb   :  { %317 = vmatpush3.bf16.msra.mxu0 %v361_v5  ;;  %350 = vmatpush3.bf16.msra.mxu1 %v361_v5 }
   0xc   :  { %318 = vmatprep.subr.bf16.mxu0 %v362_v6  ;;  %343 = vmatprep.subr.bf16.mxu1 %v362_v6 }
   0xf   :  { %319 = vmatpush3.bf16.msra.mxu0 %v363_v7  ;;  %351 = vmatpush3.bf16.msra.mxu1 %v363_v7 }
  0x10   :  { %320 = vmatprep.subr.bf16.mxu0 %v364_v8  ;;  %344 = vmatprep.subr.bf16.mxu1 %v364_v8 }
  0x13   :  { %321 = vmatpush3.bf16.msra.mxu0 %v365_v9  ;;  %352 = vmatpush3.bf16.msra.mxu1 %v365_v9 }
  0x14   :  { %322 = vmatprep.subr.bf16.mxu0 %v366_v10  ;;  %345 = vmatprep.subr.bf16.mxu1 %v366_v10 }
  0x17   :  { %323 = vmatpush3.bf16.msra.mxu0 %v367_v13  ;;  %353 = vmatpush3.bf16.msra.mxu1 %v367_v13 }
  0x18   :  { %324 = vmatprep.subr.bf16.mxu0 %v368_v14  ;;  %346 = vmatprep.subr.bf16.mxu1 %v368_v14 }
  0x1b   :  { %325 = vmatpush3.bf16.msra.mxu0 %v369_v15  ;;  %354 = vmatpush3.bf16.msra.mxu1 %v369_v15 }
  0x1c   :  { %326 = vmatprep.subr.bf16.mxu0 %v370_v16  ;;  %347 = vmatprep.subr.bf16.mxu1 %v370_v16 }
  0x1f   :  { %327 = vmatpush3.bf16.msra.mxu0 %v371_v17  ;;  %355 = vmatpush3.bf16.msra.mxu1 %v371_v17 }
  0x22   :  { %209 = vmatmul.mubr.bf16.vlgmr.msra.gmra.mxu0 %v372_v18  ;;  %217 = vmatmul.mubr.bf16.vlgmr.msra.gmra.mxu1 %v375_v19 }
  0xe2   :  { %v328_v20 = vpop.f32.mrf.mxu0  ;;  %v334_v21 = vpop.f32.mrf.mxu1 }
  0xe4   :  { %v329_v23 = vpop.f32.mrf.mxu0  ;;  %v335_v24 = vpop.f32.mrf.mxu1 }
  0xe5   :  { %v330_v25 = vadd.f32 %v329_v23, %v328_v20  ;;  %v336_v26 = vadd.f32 %v335_v24, %v334_v21 }
  0xe6   :  { %v331_v27 = vpop.f32.mrf.mxu0  ;;  %v337_v28 = vpop.f32.mrf.mxu1 }
  0xe7   :  { %v211_v29 = vadd.f32 %v330_v25, %v291_v22  ;;  %v219_v30 = vadd.f32 %v336_v26, %v291_v22 }
  0xe8   :  { %v332_v31 = vpop.f32.mrf.mxu0  ;;  %v338_v32 = vpop.f32.mrf.mxu1 }
  0xe9   :  { %279 = vst [vmem:[%s484_s3] sm:$0xff] %v211_v29  ;;  %281 = vst [vmem:[%s484_s3 + $0x10] sm:$0xff] %v219_v30  ;;  %v333_v33 = vadd.f32 %v332_v31, %v331_v27  ;;  %v339_v34 = vadd.f32 %v338_v32, %v337_v28  ;;  %v261_v37 = vmul.f32 %v211_v29, %v211_v29 }
  0xea   :  { %v263_v40 = vmul.f32 %v219_v30, %v219_v30 }
  0xeb   :  { %v214_v35 = vadd.f32 %v333_v33, %v291_v22  ;;  %v222_v36 = vadd.f32 %v339_v34, %v291_v22 }
  0xed   :  { %v252_v38 = vadd.f32 %v214_v35, %v211_v29  ;;  %v262_v39 = vmul.f32 %v214_v35, %v214_v35  ;;  %280 = vst [vmem:[%s484_s3 + $0x8] sm:$0xff] %v214_v35  ;;  %282 = vst [vmem:[%s484_s3 + $0x18] sm:$0xff] %v222_v36  ;;  %v264_v44 = vmul.f32 %v222_v36, %v222_v36 }
  0xef   :  { %v265_v41 = vadd.f32 %v262_v39, %v261_v37  ;;  %v253_v42 = vadd.f32 %v252_v38, %v219_v30 }
  0xf1   :  { %v254_v43 = vadd.f32 %v253_v42, %v222_v36  ;;  %v266_v45 = vadd.f32 %v265_v41, %v263_v40 }
  0xf3   :  { %v255_v46 = vrot.slane %v254_v43, 4  ;;  %v267_v47 = vadd.f32 %v266_v45, %v264_v44 }
  0xf5   :  { %v256_v48 = vadd.f32 %v255_v46, %v254_v43  ;;  %v268_v49 = vrot.slane %v267_v47, 4 }
  0xf7   :  { %v257_v50 = vrot.slane %v256_v48, 2  ;;  %v269_v51 = vadd.f32 %v268_v49, %v267_v47 }
  0xf9   :  { %v258_v52 = vadd.f32 %v257_v50, %v256_v48  ;;  %v270_v53 = vrot.slane %v269_v51, 2 }
  0xfb   :  { %v259_v54 = vrot.slane %v258_v52, 1  ;;  %v271_v55 = vadd.f32 %v270_v53, %v269_v51 }
  0xfd   :  { %v272_v56 = vrot.slane %v271_v55, 1  ;;  %v260_v57 = vadd.f32 %v259_v54, %v258_v52 }
  0xff   :  { %v273_v58 = vadd.f32 %v272_v56, %v271_v55 }
 0x101   :  { %v275_v59 = vsel %vm274_vm0, %v260_v57, %v273_v58 }
 0x102   :  { %v277_v60 = vsel %vm276_vm1, %v275_v59, 0.0 }
 0x103   :  { %278 = vst [vmem:[%s485_s4] sm:$0xff] %v277_v60 }

// kernel: _lambda_.12
= control target key start
LH: loop header
LB: loop body
LE: loop exit
PB: predicated region body
PF: predicated region fallthrough
CT: control target
= control target key end

     0   :  { %v24_v6 = vlaneseq  ;;  %s78_s1 = inlined_call_operand.vmem [shape: f32[1,8,128], index: 1, kind: input, shape index: {}]   ;;  %s79_s0 = inlined_call_operand.vmem [shape: f32[16,128], index: 0, kind: input, shape index: {}]   ;;  %s80_s2 = inlined_call_operand.vmem [shape: f32[16,128], index: 2, kind: output, shape index: {}]  }
   0x1   :  { %v11_v0 = vld [vmem:[%s78_s1] sm:$0xff]  ;;  %v23_v12 = vld [vmem:[%s79_s0 + $0x8] sm:$0xff] }
   0x2   :  { %v13_v1 = vmul.f32 0.125, %v11_v0  ;;  %v25_v8 = vshrl.u32 %v24_v6, 7  ;;  %v22_v11 = vld [vmem:[%s79_s0] sm:$0xff] }
   0x4   :  { %v14_v2 = vmul.f32 %v13_v1, %v13_v1  ;;  %v26_v9 = vsub.s32 0, %v25_v8  ;;  %v32_v13 = vsub.s32 1, %v25_v8 }
   0x6   :  { %v16_v3 = vrot.slane %v14_v2, 7  ;;  %v27_v10 = vrot.slane %v13_v1, %v26_v9 }
   0x8   :  { %v18_v4 = vsub.f32 %v13_v1, %v16_v3  ;;  %v28_v14 = vsub.f32 %v22_v11, %v27_v10  ;;  %v29_v15 = vsub.f32 %v23_v12, %v27_v10 }
   0xa   :  { %v19_v5 = vmax.f32 %v18_v4, 0.0 }
   0xc   :  { %v20_v7 = vadd.f32 1e-05, %v19_v5 }
   0xe   :  { %46 = vrsqrt.f32 %v20_v7 }
  0x1b   :  { %v47_v16 = vpop.eup %46 }
  0x1c   :  { %v33_v17 = vrot.slane %v47_v16, %v32_v13 }
  0x1e   :  { %v34_v18 = vmul.f32 %v33_v17, %v28_v14  ;;  %v35_v19 = vmul.f32 %v33_v17, %v29_v15 }
  0x20   :  { %v36_v20 = vmul.f32 0.2, %v34_v18  ;;  %v37_v21 = vmul.f32 0.2, %v35_v19 }
  0x22   :  { %v38_v22 = vmax.f32 %v34_v18, %v36_v20  ;;  %v39_v23 = vmax.f32 %v35_v19, %v37_v21 }
  0x24   :  { %40 = vst [vmem:[%s80_s2] sm:$0xff] %v38_v22  ;;  %41 = vst [vmem:[%s80_s2 + $0x8] sm:$0xff] %v39_v23 }

// kernel: _lambda_.11
= control target key start
LH: loop header
LB: loop body
LE: loop exit
PB: predicated region body
PF: predicated region fallthrough
CT: control target
= control target key end

     0   :  { %v473_v1 = vmov 0.0   ;;  %vm474_vm0 = vmmov 0   ;;  %vm349_vm1 = vcmask 1040384   ;;  %vm351_vm2 = vcmask 1041408   ;;  %s593_s1 = inlined_call_operand.vmem [shape: bf16[384,128], index: 1, kind: input, shape index: {}]   ;;  %s594_s0 = inlined_call_operand.vmem [shape: bf16[16,384], index: 0, kind: input, shape index: {}]   ;;  %s595_s2 = inlined_call_operand.vmem [shape: f32[1,128], index: 2, kind: input, shape index: {}]   ;;  %s596_s3 = inlined_call_operand.vmem [shape: f32[16,128], index: 3, kind: output, shape index: {0}]   ;;  %s597_s4 = inlined_call_operand.vmem [shape: f32[1,8,128], index: 4, kind: output, shape index: {1}]  }
   0x1   :  { %v445_v0 = vld [vmem:[%s593_s1 + $0x78] sm:$0xff]   ;;  %423 = vmatprep.subr.bf16.mxu1 %v473_v1  ;;  %439 = vmatprep.mubr.msk.bf16.mxu1 %vm474_vm0, %v473_v1  ;;  %v448_v4 = vld [vmem:[%s593_s1 + $0x70] sm:$0xff]   ;;  %v451_v7 = vld [vmem:[%s593_s1 + $0x68] sm:$0xff]  }
   0x2   :  { %v446_v2 = vld [vmem:[%s593_s1 + $0x38] sm:$0xff]   ;;  %392 = vmatprep.subr.bf16.mxu0 %v445_v0  ;;  %v449_v5 = vld [vmem:[%s593_s1 + $0x30] sm:$0xff]   ;;  %v452_v8 = vld [vmem:[%s593_s1 + $0x28] sm:$0xff]  }
   0x3   :  { %v447_v3 = vld [vmem:[%s593_s1 + $0xb8] sm:$0xff]   ;;  %393 = vmatpush3.bf16.msra.mxu0 %v446_v2  ;;  %v450_v6 = vld [vmem:[%s593_s1 + $0xb0] sm:$0xff]   ;;  %v453_v9 = vld [vmem:[%s593_s1 + $0xa8] sm:$0xff]  }
   0x4   :  { %424 = vmatpush3.bf16.msra.mxu1 %v447_v3  ;;  %394 = vmatprep.subr.bf16.mxu0 %v448_v4  ;;  %v454_v10 = vld [vmem:[%s593_s1 + $0x60] sm:$0xff]   ;;  %v457_v13 = vld [vmem:[%s593_s1 + $0x58] sm:$0xff]   ;;  %v460_v16 = vld [vmem:[%s593_s1 + $0x50] sm:$0xff]  }
   0x5   :  { %425 = vmatprep.subr.bf16.mxu1 %v473_v1  ;;  %v455_v11 = vld [vmem:[%s593_s1 + $0x20] sm:$0xff]   ;;  %v458_v14 = vld [vmem:[%s593_s1 + $0x18] sm:$0xff]   ;;  %v461_v17 = vld [vmem:[%s593_s1 + $0x10] sm:$0xff]  }
   0x6   :  { %v456_v12 = vld [vmem:[%s593_s1 + $0xa0] sm:$0xff]   ;;  %v459_v15 = vld [vmem:[%s593_s1 + $0x98] sm:$0xff]   ;;  %v462_v18 = vld [vmem:[%s593_s1 + $0x90] sm:$0xff]  }
   0x7   :  { %395 = vmatpush3.bf16.msra.mxu0 %v449_v5  ;;  %v463_v19 = vld [vmem:[%s593_s1 + $0x48] sm:$0xff]   ;;  %v466_v22 = vld [vmem:[%s593_s1 + $0x40] sm:$0xff]  }
   0x8   :  { %426 = vmatpush3.bf16.msra.mxu1 %v450_v6  ;;  %396 = vmatprep.subr.bf16.mxu0 %v451_v7  ;;  %v464_v20 = vld [vmem:[%s593_s1 + $0x8] sm:$0xff]   ;;  %v471_v23 = vld [vmem:[%s594_s0 + $0x4] ss:$12 sps:$4 sm:$0xff]   ;;  %v364_v30 = vld [vmem:[%s595_s2] ss:$0 sm:$0xff] }
   0x9   :  { %427 = vmatprep.subr.bf16.mxu1 %v473_v1  ;;  %v465_v21 = vld [vmem:[%s593_s1 + $0x88] sm:$0xff]   ;;  %v467_v24 = vld [vmem:[%s593_s1] sm:$0xff]   ;;  %268 = vmatprep.mubr.bf16.mxu0 %v471_v23 }
   0xa   :  { %v468_v25 = vld [vmem:[%s593_s1 + $0x80] sm:$0xff]   ;;  %v472_v27 = vld [vmem:[%s594_s0 + $0x8] ss:$12 sps:$4 sm:$0xff]  }
   0xb   :  { %397 = vmatpush3.bf16.msra.mxu0 %v452_v8  ;;  %v469_v26 = vld [vmem:[%s594_s0] ss:$12 sps:$4 sm:$0xff]  }
   0xc   :  { %428 = vmatpush3.bf16.msra.mxu1 %v453_v9  ;;  %398 = vmatprep.subr.bf16.mxu0 %v454_v10 }
   0xd   :  { %429 = vmatprep.subr.bf16.mxu1 %v473_v1 }
   0xf   :  { %399 = vmatpush3.bf16.msra.mxu0 %v455_v11 }
  0x10   :  { %430 = vmatpush3.bf16.msra.mxu1 %v456_v12  ;;  %400 = vmatprep.subr.bf16.mxu0 %v457_v13 }
  0x11   :  { %431 = vmatprep.subr.bf16.mxu1 %v473_v1 }
  0x13   :  { %401 = vmatpush3.bf16.msra.mxu0 %v458_v14 }
  0x14   :  { %432 = vmatpush3.bf16.msra.mxu1 %v459_v15  ;;  %402 = vmatprep.subr.bf16.mxu0 %v460_v16 }
  0x15   :  { %433 = vmatprep.subr.bf16.mxu1 %v473_v1 }
  0x17   :  { %403 = vmatpush3.bf16.msra.mxu0 %v461_v17 }
  0x18   :  { %434 = vmatpush3.bf16.msra.mxu1 %v462_v18  ;;  %404 = vmatprep.subr.bf16.mxu0 %v463_v19 }
  0x19   :  { %435 = vmatprep.subr.bf16.mxu1 %v473_v1 }
  0x1b   :  { %405 = vmatpush3.bf16.msra.mxu0 %v464_v20 }
  0x1c   :  { %436 = vmatpush3.bf16.msra.mxu1 %v465_v21  ;;  %406 = vmatprep.subr.bf16.mxu0 %v466_v22 }
  0x1d   :  { %437 = vmatprep.subr.bf16.mxu1 %v473_v1 }
  0x1f   :  { %407 = vmatpush3.bf16.msra.mxu0 %v467_v24 }
  0x20   :  { %438 = vmatpush3.bf16.msra.mxu1 %v468_v25 }
  0x22   :  { %269 = vmatmul.mubr.bf16.vlgmr.msra.gmra.mxu0 %v469_v26 }
  0x23   :  { %440 = vmatmul.mubr.bf16.vlgmr.msra.gmra.mxu1 %v472_v27 }
  0xe2   :  { %v408_v28 = vpop.f32.mrf.mxu0 }
  0xe3   :  { %v311_v29 = vpop.f32.mrf.mxu1 }
  0xe4   :  { %v409_v31 = vpop.f32.mrf.mxu0 }
  0xe5   :  { %v410_v32 = vadd.f32 %v409_v31, %v408_v28  ;;  %v441_v33 = vpop.f32.mrf.mxu1 }
  0xe6   :  { %v411_v34 = vpop.f32.mrf.mxu0 }
  0xe7   :  { %v271_v35 = vadd.f32 %v410_v32, %v364_v30  ;;  %v314_v36 = vpop.f32.mrf.mxu1 }
  0xe8   :  { %v412_v37 = vpop.f32.mrf.mxu0 }
  0xe9   :  { %v312_v38 = vadd.f32 %v311_v29, %v271_v35  ;;  %v413_v39 = vadd.f32 %v412_v37, %v411_v34  ;;  %v442_v40 = vpop.f32.mrf.mxu1 }
  0xeb   :  { %v334_v41 = vrot.slane %v312_v38, 4  ;;  %v340_v42 = vmul.f32 %v312_v38, %v312_v38  ;;  %v274_v43 = vadd.f32 %v413_v39, %v364_v30  ;;  %354 = vst [vmem:[%s596_s3] sm:$0xff] %v312_v38 }
  0xed   :  { %v335_v44 = vadd.f32 %v334_v41, %v312_v38  ;;  %v343_v45 = vrot.slane %v340_v42, 4  ;;  %v315_v46 = vadd.f32 %v314_v36, %v274_v43 }
  0xef   :  { %v336_v47 = vrot.slane %v335_v44, 2  ;;  %v344_v48 = vadd.f32 %v343_v45, %v340_v42  ;;  %355 = vst [vmem:[%s596_s3 + $0x8] sm:$0xff] %v315_v46 }
  0xf1   :  { %v337_v49 = vadd.f32 %v336_v47, %v335_v44  ;;  %v345_v50 = vrot.slane %v344_v48, 2 }
  0xf3   :  { %v338_v51 = vrot.slane %v337_v49, 1  ;;  %v346_v52 = vadd.f32 %v345_v50, %v344_v48 }
  0xf5   :  { %v347_v53 = vrot.slane %v346_v52, 1  ;;  %v339_v54 = vadd.f32 %v338_v51, %v337_v49 }
  0xf7   :  { %v348_v55 = vadd.f32 %v347_v53, %v346_v52 }
  0xf9   :  { %v350_v56 = vsel %vm349_vm1, %v339_v54, %v348_v55 }
  0xfa   :  { %v352_v57 = vsel %vm351_vm2, %v350_v56, 0.0 }
  0xfb   :  { %353 = vst [vmem:[%s597_s4] sm:$0xff] %v352_v57 }

// kernel: _lambda_.13
= control target key start
LH: loop header
LB: loop body
LE: loop exit
PB: predicated region body
PF: predicated region fallthrough
CT: control target
= control target key end

     0   :  { %v713_v33 = vmov 0.0   ;;  %vm714_vm0 = vmmov 0   ;;  %vm530_vm1 = vcmask 1040384   ;;  %vm532_vm2 = vcmask 1041408   ;;  %s887_s1 = inlined_call_operand.vmem [shape: bf16[640,128], index: 1, kind: input, shape index: {}]   ;;  %s888_s0 = inlined_call_operand.vmem [shape: bf16[16,640], index: 0, kind: input, shape index: {}]   ;;  %s889_s2 = inlined_call_operand.vmem [shape: f32[1,128], index: 2, kind: input, shape index: {}]   ;;  %s890_s3 = inlined_call_operand.vmem [shape: f32[16,128], index: 3, kind: output, shape index: {0}]   ;;  %s891_s4 = inlined_call_operand.vmem [shape: f32[1,8,128], index: 4, kind: output, shape index: {1}]  }
   0x1   :  { %v666_v0 = vld [vmem:[%s887_s1 + $0x78] sm:$0xff]   ;;  %v670_v4 = vld [vmem:[%s887_s1 + $0x70] sm:$0xff]   ;;  %v674_v8 = vld [vmem:[%s887_s1 + $0x68] sm:$0xff]  }
   0x2   :  { %v667_v1 = vld [vmem:[%s887_s1 + $0x38] sm:$0xff]   ;;  %591 = vmatprep.subr.bf16.mxu0 %v666_v0  ;;  %v671_v5 = vld [vmem:[%s887_s1 + $0x30] sm:$0xff]   ;;  %v675_v9 = vld [vmem:[%s887_s1 + $0x28] sm:$0xff]  }
   0x3   :  { %v668_v2 = vld [vmem:[%s887_s1 + $0xf8] sm:$0xff]   ;;  %592 = vmatpush3.bf16.msra.mxu0 %v667_v1  ;;  %v672_v6 = vld [vmem:[%s887_s1 + $0xf0] sm:$0xff]   ;;  %v676_v10 = vld [vmem:[%s887_s1 + $0xe8] sm:$0xff]  }
   0x4   :  { %v669_v3 = vld [vmem:[%s887_s1 + $0xb8] sm:$0xff]   ;;  %613 = vmatprep.subr.bf16.mxu1 %v668_v2  ;;  %593 = vmatprep.subr.bf16.mxu0 %v670_v4  ;;  %v673_v7 = vld [vmem:[%s887_s1 + $0xb0] sm:$0xff]   ;;  %v677_v11 = vld [vmem:[%s887_s1 + $0xa8] sm:$0xff]  }
   0x5   :  { %614 = vmatpush3.bf16.msra.mxu1 %v669_v3  ;;  %v678_v12 = vld [vmem:[%s887_s1 + $0x60] sm:$0xff]   ;;  %v682_v16 = vld [vmem:[%s887_s1 + $0x58] sm:$0xff]   ;;  %v686_v20 = vld [vmem:[%s887_s1 + $0x50] sm:$0xff]  }
   0x6   :  { %615 = vmatprep.subr.bf16.mxu1 %v672_v6  ;;  %v679_v13 = vld [vmem:[%s887_s1 + $0x20] sm:$0xff]   ;;  %v683_v17 = vld [vmem:[%s887_s1 + $0x18] sm:$0xff]   ;;  %v687_v21 = vld [vmem:[%s887_s1 + $0x10] sm:$0xff]  }
   0x7   :  { %594 = vmatpush3.bf16.msra.mxu0 %v671_v5  ;;  %v680_v14 = vld [vmem:[%s887_s1 + $0xe0] sm:$0xff]   ;;  %v684_v18 = vld [vmem:[%s887_s1 + $0xd8] sm:$0xff]   ;;  %v688_v22 = vld [vmem:[%s887_s1 + $0xd0] sm:$0xff]  }
   0x8   :  { %595 = vmatprep.subr.bf16.mxu0 %v674_v8  ;;  %v681_v15 = vld [vmem:[%s887_s1 + $0xa0] sm:$0xff]   ;;  %v685_v19 = vld [vmem:[%s887_s1 + $0x98] sm:$0xff]   ;;  %v689_v23 = vld [vmem:[%s887_s1 + $0x90] sm:$0xff]  }
   0x9   :  { %616 = vmatpush3.bf16.msra.mxu1 %v673_v7  ;;  %v690_v24 = vld [vmem:[%s887_s1 + $0x48] sm:$0xff]   ;;  %v694_v28 = vld [vmem:[%s887_s1 + $0x40] sm:$0xff]   ;;  %v704_v37 = vld [vmem:[%s887_s1 + $0x138] sm:$0xff]  }
   0xa   :  { %617 = vmatprep.subr.bf16.mxu1 %v676_v10  ;;  %v691_v25 = vld [vmem:[%s887_s1 + $0x8] sm:$0xff]   ;;  %v695_v29 = vld [vmem:[%s887_s1] sm:$0xff]   ;;  %v705_v38 = vld [vmem:[%s887_s1 + $0x130] sm:$0xff]  }
   0xb   :  { %596 = vmatpush3.bf16.msra.mxu0 %v675_v9  ;;  %v692_v26 = vld [vmem:[%s887_s1 + $0xc8] sm:$0xff]   ;;  %v696_v30 = vld [vmem:[%s887_s1 + $0xc0] sm:$0xff]   ;;  %v708_v41 = vld [vmem:[%s887_s1 + $0x118] sm:$0xff]  }
   0xc   :  { %597 = vmatprep.subr.bf16.mxu0 %v678_v12  ;;  %v693_v27 = vld [vmem:[%s887_s1 + $0x88] sm:$0xff]   ;;  %v697_v31 = vld [vmem:[%s888_s0] ss:$20 sps:$4 sm:$0xff]   ;;  %v699_v32 = vld [vmem:[%s888_s0 + $0x4] ss:$20 sps:$4 sm:$0xff]  }
   0xd   :  { %618 = vmatpush3.bf16.msra.mxu1 %v677_v11  ;;  %v700_v34 = vld [vmem:[%s887_s1 + $0x80] sm:$0xff]   ;;  %408 = vmatprep.mubr.bf16.mxu0 %v699_v32  ;;  %v701_v35 = vld [vmem:[%s888_s0 + $0x8] ss:$20 sps:$4 sm:$0xff]   ;;  %v709_v42 = vld [vmem:[%s887_s1 + $0x110] sm:$0xff]  }
   0xe   :  { %619 = vmatprep.subr.bf16.mxu1 %v680_v14  ;;  %v703_v36 = vld [vmem:[%s888_s0 + $0xc] ss:$20 sps:$4 sm:$0xff]   ;;  %v712_v45 = vld [vmem:[%s888_s0 + $0x10] ss:$20 sps:$4 sm:$0xff]  }
   0xf   :  { %598 = vmatpush3.bf16.msra.mxu0 %v679_v13  ;;  %449 = vmatprep.mubr.bf16.mxu1 %v703_v36  ;;  %v706_v39 = vld [vmem:[%s887_s1 + $0x128] sm:$0xff]   ;;  %v707_v40 = vld [vmem:[%s887_s1 + $0x120] sm:$0xff]  }
  0x10   :  { %599 = vmatprep.subr.bf16.mxu0 %v682_v16  ;;  %v710_v43 = vld [vmem:[%s887_s1 + $0x108] sm:$0xff]   ;;  %v711_v44 = vld [vmem:[%s887_s1 + $0x100] sm:$0xff]  }
  0x11   :  { %620 = vmatpush3.bf16.msra.mxu1 %v681_v15  ;;  %v545_v52 = vld [vmem:[%s889_s2] ss:$0 sm:$0xff] }
  0x12   :  { %621 = vmatprep.subr.bf16.mxu1 %v684_v18 }
  0x13   :  { %600 = vmatpush3.bf16.msra.mxu0 %v683_v17 }
  0x14   :  { %601 = vmatprep.subr.bf16.mxu0 %v686_v20 }
  0x15   :  { %622 = vmatpush3.bf16.msra.mxu1 %v685_v19 }
  0x16   :  { %623 = vmatprep.subr.bf16.mxu1 %v688_v22 }
  0x17   :  { %602 = vmatpush3.bf16.msra.mxu0 %v687_v21 }
  0x18   :  { %603 = vmatprep.subr.bf16.mxu0 %v690_v24 }
  0x19   :  { %624 = vmatpush3.bf16.msra.mxu1 %v689_v23 }
  0x1a   :  { %625 = vmatprep.subr.bf16.mxu1 %v692_v26 }
  0x1b   :  { %604 = vmatpush3.bf16.msra.mxu0 %v691_v25 }
  0x1c   :  { %605 = vmatprep.subr.bf16.mxu0 %v694_v28 }
  0x1d   :  { %626 = vmatpush3.bf16.msra.mxu1 %v693_v27 }
  0x1e   :  { %627 = vmatprep.subr.bf16.mxu1 %v696_v30 }
  0x1f   :  { %606 = vmatpush3.bf16.msra.mxu0 %v695_v29 }
  0x20   :  { %644 = vmatprep.subr.bf16.mxu0 %v713_v33 }
  0x21   :  { %628 = vmatpush3.bf16.msra.mxu1 %v700_v34 }
  0x22   :  { %409 = vmatmul.mubr.bf16.vlgmr.msra.gmra.mxu0 %v697_v31 }
  0x23   :  { %660 = vmatprep.mubr.msk.bf16.mxu0 %vm714_vm0, %v713_v33  ;;  %645 = vmatpush3.bf16.msra.mxu0 %v704_v37 }
  0x24   :  { %450 = vmatmul.mubr.bf16.vlgmr.msra.gmra.mxu1 %v701_v35  ;;  %646 = vmatprep.subr.bf16.mxu0 %v713_v33 }
  0x27   :  { %647 = vmatpush3.bf16.msra.mxu0 %v705_v38 }
  0x28   :  { %648 = vmatprep.subr.bf16.mxu0 %v713_v33 }
  0x2b   :  { %649 = vmatpush3.bf16.msra.mxu0 %v706_v39 }
  0x2c   :  { %650 = vmatprep.subr.bf16.mxu0 %v713_v33 }
  0x2f   :  { %651 = vmatpush3.bf16.msra.mxu0 %v707_v40 }
  0x30   :  { %652 = vmatprep.subr.bf16.mxu0 %v713_v33 }
  0x33   :  { %653 = vmatpush3.bf16.msra.mxu0 %v708_v41 }
  0x34   :  { %654 = vmatprep.subr.bf16.mxu0 %v713_v33 }
  0x37   :  { %655 = vmatpush3.bf16.msra.mxu0 %v709_v42 }
  0x38   :  { %656 = vmatprep.subr.bf16.mxu0 %v713_v33 }
  0x3b   :  { %657 = vmatpush3.bf16.msra.mxu0 %v710_v43 }
  0x3c   :  { %658 = vmatprep.subr.bf16.mxu0 %v713_v33 }
  0x3f   :  { %659 = vmatpush3.bf16.msra.mxu0 %v711_v44 }
  0x42   :  { %661 = vmatmul.mubr.bf16.vlgmr.msra.gmra.mxu0 %v712_v45 }
  0xe2   :  { %v607_v46 = vpop.f32.mrf.mxu0 }
  0xe4   :  { %v608_v47 = vpop.f32.mrf.mxu0  ;;  %v629_v48 = vpop.f32.mrf.mxu1 }
  0xe5   :  { %v609_v51 = vadd.f32 %v608_v47, %v607_v46 }
  0xe6   :  { %v610_v49 = vpop.f32.mrf.mxu0  ;;  %v630_v50 = vpop.f32.mrf.mxu1 }
  0xe7   :  { %v411_v55 = vadd.f32 %v609_v51, %v545_v52  ;;  %v631_v56 = vadd.f32 %v630_v50, %v629_v48 }
  0xe8   :  { %v611_v53 = vpop.f32.mrf.mxu0  ;;  %v632_v54 = vpop.f32.mrf.mxu1 }
  0xe9   :  { %v612_v57 = vadd.f32 %v611_v53, %v610_v49  ;;  %v452_v61 = vadd.f32 %v631_v56, %v411_v55 }
  0xea   :  { %v633_v58 = vpop.f32.mrf.mxu1 }
  0xeb   :  { %v414_v59 = vadd.f32 %v612_v57, %v545_v52  ;;  %v634_v60 = vadd.f32 %v633_v58, %v632_v54 }
  0xed   :  { %v455_v3 = vadd.f32 %v634_v60, %v414_v59 }
 0x102   :  { %v492_v62 = vpop.f32.mrf.mxu0 }
 0x103   :  { %v493_v63 = vadd.f32 %v492_v62, %v452_v61 }
 0x104   :  { %v662_v0 = vpop.f32.mrf.mxu0 }
 0x105   :  { %v515_v1 = vrot.slane %v493_v63, 4  ;;  %v521_v2 = vmul.f32 %v493_v63, %v493_v63  ;;  %535 = vst [vmem:[%s890_s3] sm:$0xff] %v493_v63 }
 0x106   :  { %v495_v4 = vpop.f32.mrf.mxu0 }
 0x107   :  { %v516_v5 = vadd.f32 %v515_v1, %v493_v63  ;;  %v524_v6 = vrot.slane %v521_v2, 4  ;;  %v496_v7 = vadd.f32 %v495_v4, %v455_v3 }
 0x108   :  { %v663_v8 = vpop.f32.mrf.mxu0 }
 0x109   :  { %v517_v9 = vrot.slane %v516_v5, 2  ;;  %v525_v10 = vadd.f32 %v524_v6, %v521_v2  ;;  %536 = vst [vmem:[%s890_s3 + $0x8] sm:$0xff] %v496_v7 }
 0x10b   :  { %v518_v11 = vadd.f32 %v517_v9, %v516_v5  ;;  %v526_v12 = vrot.slane %v525_v10, 2 }
 0x10d   :  { %v519_v13 = vrot.slane %v518_v11, 1  ;;  %v527_v14 = vadd.f32 %v526_v12, %v525_v10 }
 0x10f   :  { %v528_v15 = vrot.slane %v527_v14, 1  ;;  %v520_v16 = vadd.f32 %v519_v13, %v518_v11 }
 0x111   :  { %v529_v17 = vadd.f32 %v528_v15, %v527_v14 }
 0x113   :  { %v531_v18 = vsel %vm530_vm1, %v520_v16, %v529_v17 }
 0x114   :  { %v533_v19 = vsel %vm532_vm2, %v531_v18, 0.0 }
 0x115   :  { %534 = vst [vmem:[%s891_s4] sm:$0xff] %v533_v19 }

// kernel: _lambda_.15
= control target key start
LH: loop header
LB: loop body
LE: loop exit
PB: predicated region body
PF: predicated region fallthrough
CT: control target
= control target key end

     0   :  { %vm1152_vm0 = vmmov 0   ;;  %s1425_s1 = inlined_call_operand.vmem [shape: bf16[1152,128], index: 1, kind: input, shape index: {}]   ;;  %s1426_s0 = inlined_call_operand.vmem [shape: bf16[16,1152], index: 0, kind: input, shape index: {}]   ;;  %s1427_s2 = inlined_call_operand.vmem [shape: f32[1,128], index: 2, kind: input, shape index: {}]   ;;  %s1428_s3 = inlined_call_operand.vmem [shape: f32[16,128], index: 3, kind: output, shape index: {}]  }
   0x1   :  { %v1066_v0 = vld [vmem:[%s1425_s1 + $0x78] sm:$0xff]   ;;  %v1070_v4 = vld [vmem:[%s1425_s1 + $0x70] sm:$0xff]   ;;  %v1074_v8 = vld [vmem:[%s1425_s1 + $0x68] sm:$0xff]  }
   0x2   :  { %v1067_v1 = vld [vmem:[%s1425_s1 + $0x38] sm:$0xff]   ;;  %947 = vmatprep.subr.bf16.mxu0 %v1066_v0  ;;  %v1071_v5 = vld [vmem:[%s1425_s1 + $0x30] sm:$0xff]   ;;  %v1075_v9 = vld [vmem:[%s1425_s1 + $0x28] sm:$0xff]  }
   0x3   :  { %v1068_v2 = vld [vmem:[%s1425_s1 + $0xf8] sm:$0xff]   ;;  %948 = vmatpush3.bf16.msra.mxu0 %v1067_v1  ;;  %v1072_v6 = vld [vmem:[%s1425_s1 + $0xf0] sm:$0xff]   ;;  %v1076_v10 = vld [vmem:[%s1425_s1 + $0xe8] sm:$0xff]  }
   0x4   :  { %v1069_v3 = vld [vmem:[%s1425_s1 + $0xb8] sm:$0xff]   ;;  %969 = vmatprep.subr.bf16.mxu1 %v1068_v2  ;;  %949 = vmatprep.subr.bf16.mxu0 %v1070_v4  ;;  %v1073_v7 = vld [vmem:[%s1425_s1 + $0xb0] sm:$0xff]   ;;  %v1077_v11 = vld [vmem:[%s1425_s1 + $0xa8] sm:$0xff]  }
   0x5   :  { %970 = vmatpush3.bf16.msra.mxu1 %v1069_v3  ;;  %v1078_v12 = vld [vmem:[%s1425_s1 + $0x60] sm:$0xff]   ;;  %v1082_v16 = vld [vmem:[%s1425_s1 + $0x58] sm:$0xff]   ;;  %v1086_v20 = vld [vmem:[%s1425_s1 + $0x50] sm:$0xff]  }
   0x6   :  { %971 = vmatprep.subr.bf16.mxu1 %v1072_v6  ;;  %v1079_v13 = vld [vmem:[%s1425_s1 + $0x20] sm:$0xff]   ;;  %v1083_v17 = vld [vmem:[%s1425_s1 + $0x18] sm:$0xff]   ;;  %v1087_v21 = vld [vmem:[%s1425_s1 + $0x10] sm:$0xff]   ;;  %v1151_v6 = vmov 0.0  }
   0x7   :  { %950 = vmatpush3.bf16.msra.mxu0 %v1071_v5  ;;  %v1080_v14 = vld [vmem:[%s1425_s1 + $0xe0] sm:$0xff]   ;;  %v1084_v18 = vld [vmem:[%s1425_s1 + $0xd8] sm:$0xff]   ;;  %v1088_v22 = vld [vmem:[%s1425_s1 + $0xd0] sm:$0xff]  }
   0x8   :  { %951 = vmatprep.subr.bf16.mxu0 %v1074_v8  ;;  %v1081_v15 = vld [vmem:[%s1425_s1 + $0xa0] sm:$0xff]   ;;  %v1085_v19 = vld [vmem:[%s1425_s1 + $0x98] sm:$0xff]   ;;  %v1089_v23 = vld [vmem:[%s1425_s1 + $0x90] sm:$0xff]  }
   0x9   :  { %972 = vmatpush3.bf16.msra.mxu1 %v1073_v7  ;;  %v1090_v24 = vld [vmem:[%s1425_s1 + $0x48] sm:$0xff]   ;;  %v1094_v28 = vld [vmem:[%s1425_s1 + $0x40] sm:$0xff]   ;;  %v1101_v34 = vld [vmem:[%s1425_s1 + $0x178] sm:$0xff]  }
   0xa   :  { %973 = vmatprep.subr.bf16.mxu1 %v1076_v10  ;;  %v1091_v25 = vld [vmem:[%s1425_s1 + $0x8] sm:$0xff]   ;;  %v1095_v29 = vld [vmem:[%s1425_s1] sm:$0xff]   ;;  %v1105_v37 = vld [vmem:[%s1425_s1 + $0x138] sm:$0xff]  }
   0xb   :  { %952 = vmatpush3.bf16.msra.mxu0 %v1075_v9  ;;  %v1092_v26 = vld [vmem:[%s1425_s1 + $0xc8] sm:$0xff]   ;;  %v1096_v30 = vld [vmem:[%s1425_s1 + $0xc0] sm:$0xff]   ;;  %v1106_v38 = vld [vmem:[%s1425_s1 + $0x1f8] sm:$0xff]  }
   0xc   :  { %953 = vmatprep.subr.bf16.mxu0 %v1078_v12  ;;  %v1093_v27 = vld [vmem:[%s1425_s1 + $0x88] sm:$0xff]   ;;  %v1097_v31 = vld [vmem:[%s1426_s0] ss:$36 sps:$4 sm:$0xff]   ;;  %v1107_v39 = vld [vmem:[%s1425_s1 + $0x1b8] sm:$0xff]  }
   0xd   :  { %974 = vmatpush3.bf16.msra.mxu1 %v1077_v11  ;;  %v1099_v32 = vld [vmem:[%s1426_s0 + $0x4] ss:$36 sps:$4 sm:$0xff]   ;;  %v1104_v36 = vld [vmem:[%s1426_s0 + $0xc] ss:$36 sps:$4 sm:$0xff]   ;;  %v1120_v52 = vld [vmem:[%s1425_s1 + $0x158] sm:$0xff]  }
   0xe   :  { %975 = vmatprep.subr.bf16.mxu1 %v1080_v14  ;;  %v1100_v33 = vld [vmem:[%s1425_s1 + $0x80] sm:$0xff]   ;;  %686 = vmatprep.mubr.bf16.mxu0 %v1099_v32  ;;  %v1102_v35 = vld [vmem:[%s1426_s0 + $0x8] ss:$36 sps:$4 sm:$0xff]   ;;  %v1108_v40 = vld [vmem:[%s1425_s1 + $0x170] sm:$0xff]  }
   0xf   :  { %954 = vmatpush3.bf16.msra.mxu0 %v1079_v13  ;;  %727 = vmatprep.mubr.bf16.mxu1 %v1104_v36  ;;  %v1109_v41 = vld [vmem:[%s1425_s1 + $0x130] sm:$0xff]   ;;  %v1112_v44 = vld [vmem:[%s1425_s1 + $0x168] sm:$0xff]   ;;  %v1116_v48 = vld [vmem:[%s1425_s1 + $0x160] sm:$0xff]  }
  0x10   :  { %955 = vmatprep.subr.bf16.mxu0 %v1082_v16  ;;  %v1110_v42 = vld [vmem:[%s1425_s1 + $0x1f0] sm:$0xff]   ;;  %v1113_v45 = vld [vmem:[%s1425_s1 + $0x128] sm:$0xff]   ;;  %v1117_v49 = vld [vmem:[%s1425_s1 + $0x120] sm:$0xff]  }
  0x11   :  { %976 = vmatpush3.bf16.msra.mxu1 %v1081_v15  ;;  %v1111_v43 = vld [vmem:[%s1425_s1 + $0x1b0] sm:$0xff]   ;;  %v1114_v46 = vld [vmem:[%s1425_s1 + $0x1e8] sm:$0xff]   ;;  %v1118_v50 = vld [vmem:[%s1425_s1 + $0x1e0] sm:$0xff]  }
  0x12   :  { %977 = vmatprep.subr.bf16.mxu1 %v1084_v18  ;;  %v1115_v47 = vld [vmem:[%s1425_s1 + $0x1a8] sm:$0xff]   ;;  %v1119_v51 = vld [vmem:[%s1425_s1 + $0x1a0] sm:$0xff]   ;;  %v1121_v53 = vld [vmem:[%s1425_s1 + $0x118] sm:$0xff]  }
  0x13   :  { %956 = vmatpush3.bf16.msra.mxu0 %v1083_v17  ;;  %v1122_v54 = vld [vmem:[%s1425_s1 + $0x1d8] sm:$0xff]   ;;  %v1124_v56 = vld [vmem:[%s1425_s1 + $0x150] sm:$0xff]   ;;  %v1128_v60 = vld [vmem:[%s1425_s1 + $0x148] sm:$0xff]  }
  0x14   :  { %957 = vmatprep.subr.bf16.mxu0 %v1086_v20  ;;  %v1123_v55 = vld [vmem:[%s1425_s1 + $0x198] sm:$0xff]   ;;  %v1125_v57 = vld [vmem:[%s1425_s1 + $0x110] sm:$0xff]   ;;  %v1129_v61 = vld [vmem:[%s1425_s1 + $0x108] sm:$0xff]  }
  0x15   :  { %978 = vmatpush3.bf16.msra.mxu1 %v1085_v19  ;;  %v1126_v58 = vld [vmem:[%s1425_s1 + $0x1d0] sm:$0xff]   ;;  %v1130_v62 = vld [vmem:[%s1425_s1 + $0x1c8] sm:$0xff]   ;;  %v1132_v0 = vld [vmem:[%s1425_s1 + $0x140] sm:$0xff]  }
  0x16   :  { %979 = vmatprep.subr.bf16.mxu1 %v1088_v22  ;;  %v1127_v59 = vld [vmem:[%s1425_s1 + $0x190] sm:$0xff]   ;;  %v1131_v63 = vld [vmem:[%s1425_s1 + $0x188] sm:$0xff]   ;;  %v1133_v1 = vld [vmem:[%s1425_s1 + $0x100] sm:$0xff]  }
  0x17   :  { %958 = vmatpush3.bf16.msra.mxu0 %v1087_v21  ;;  %v1134_v2 = vld [vmem:[%s1425_s1 + $0x1c0] sm:$0xff]   ;;  %v1135_v3 = vld [vmem:[%s1426_s0 + $0x10] ss:$36 sps:$4 sm:$0xff]   ;;  %v1139_v7 = vld [vmem:[%s1426_s0 + $0x18] ss:$36 sps:$4 sm:$0xff]  }
  0x18   :  { %959 = vmatprep.subr.bf16.mxu0 %v1090_v24  ;;  %v1137_v4 = vld [vmem:[%s1426_s0 + $0x14] ss:$36 sps:$4 sm:$0xff]   ;;  %v1138_v5 = vld [vmem:[%s1425_s1 + $0x180] sm:$0xff]   ;;  %v1144_v11 = vld [vmem:[%s1425_s1 + $0x228] sm:$0xff]  }
  0x19   :  { %980 = vmatpush3.bf16.msra.mxu1 %v1089_v23  ;;  %v1141_v8 = vld [vmem:[%s1426_s0 + $0x1c] ss:$36 sps:$4 sm:$0xff]   ;;  %v1143_v10 = vld [vmem:[%s1425_s1 + $0x230] sm:$0xff]   ;;  %v1148_v15 = vld [vmem:[%s1425_s1 + $0x208] sm:$0xff]  }
  0x1a   :  { %981 = vmatprep.subr.bf16.mxu1 %v1092_v26  ;;  %v1142_v9 = vld [vmem:[%s1425_s1 + $0x238] sm:$0xff]   ;;  %v1145_v12 = vld [vmem:[%s1425_s1 + $0x220] sm:$0xff]   ;;  %v1147_v14 = vld [vmem:[%s1425_s1 + $0x210] sm:$0xff]  }
  0x1b   :  { %960 = vmatpush3.bf16.msra.mxu0 %v1091_v25  ;;  %v1146_v13 = vld [vmem:[%s1425_s1 + $0x218] sm:$0xff]   ;;  %v1149_v16 = vld [vmem:[%s1425_s1 + $0x200] sm:$0xff]  }
  0x1c   :  { %961 = vmatprep.subr.bf16.mxu0 %v1094_v28  ;;  %v1150_v17 = vld [vmem:[%s1426_s0 + $0x20] ss:$36 sps:$4 sm:$0xff]  }
  0x1d   :  { %982 = vmatpush3.bf16.msra.mxu1 %v1093_v27 }
  0x1e   :  { %983 = vmatprep.subr.bf16.mxu1 %v1096_v30  ;;  %v865_v30 = vld [vmem:[%s1427_s2] ss:$0 sm:$0xff] }
  0x1f   :  { %962 = vmatpush3.bf16.msra.mxu0 %v1095_v29 }
  0x20   :  { %991 = vmatprep.subr.bf16.mxu0 %v1101_v34 }
  0x21   :  { %984 = vmatpush3.bf16.msra.mxu1 %v1100_v33 }
  0x22   :  { %687 = vmatmul.mubr.bf16.vlgmr.msra.gmra.mxu0 %v1097_v31  ;;  %1013 = vmatprep.subr.bf16.mxu1 %v1106_v38 }
  0x23   :  { %992 = vmatpush3.bf16.msra.mxu0 %v1105_v37  ;;  %768 = vmatprep.mubr.bf16.mxu0 %v1137_v4 }
  0x24   :  { %728 = vmatmul.mubr.bf16.vlgmr.msra.gmra.mxu1 %v1102_v35  ;;  %993 = vmatprep.subr.bf16.mxu0 %v1108_v40 }
  0x25   :  { %1014 = vmatpush3.bf16.msra.mxu1 %v1107_v39  ;;  %809 = vmatprep.mubr.bf16.mxu1 %v1141_v8 }
  0x26   :  { %1015 = vmatprep.subr.bf16.mxu1 %v1110_v42 }
  0x27   :  { %994 = vmatpush3.bf16.msra.mxu0 %v1109_v41 }
  0x28   :  { %995 = vmatprep.subr.bf16.mxu0 %v1112_v44 }
  0x29   :  { %1016 = vmatpush3.bf16.msra.mxu1 %v1111_v43 }
  0x2a   :  { %1017 = vmatprep.subr.bf16.mxu1 %v1114_v46 }
  0x2b   :  { %996 = vmatpush3.bf16.msra.mxu0 %v1113_v45 }
  0x2c   :  { %997 = vmatprep.subr.bf16.mxu0 %v1116_v48 }
  0x2d   :  { %1018 = vmatpush3.bf16.msra.mxu1 %v1115_v47 }
  0x2e   :  { %1019 = vmatprep.subr.bf16.mxu1 %v1118_v50 }
  0x2f   :  { %998 = vmatpush3.bf16.msra.mxu0 %v1117_v49 }
  0x30   :  { %999 = vmatprep.subr.bf16.mxu0 %v1120_v52 }
  0x31   :  { %1020 = vmatpush3.bf16.msra.mxu1 %v1119_v51 }
  0x32   :  { %1021 = vmatprep.subr.bf16.mxu1 %v1122_v54 }
  0x33   :  { %1000 = vmatpush3.bf16.msra.mxu0 %v1121_v53 }
  0x34   :  { %1001 = vmatprep.subr.bf16.mxu0 %v1124_v56 }
  0x35   :  { %1022 = vmatpush3.bf16.msra.mxu1 %v1123_v55 }
  0x36   :  { %1023 = vmatprep.subr.bf16.mxu1 %v1126_v58 }
  0x37   :  { %1002 = vmatpush3.bf16.msra.mxu0 %v1125_v57 }
  0x38   :  { %1003 = vmatprep.subr.bf16.mxu0 %v1128_v60 }
  0x39   :  { %1024 = vmatpush3.bf16.msra.mxu1 %v1127_v59 }
  0x3a   :  { %1025 = vmatprep.subr.bf16.mxu1 %v1130_v62 }
  0x3b   :  { %1004 = vmatpush3.bf16.msra.mxu0 %v1129_v61 }
  0x3c   :  { %1005 = vmatprep.subr.bf16.mxu0 %v1132_v0 }
  0x3d   :  { %1026 = vmatpush3.bf16.msra.mxu1 %v1131_v63 }
  0x3e   :  { %1027 = vmatprep.subr.bf16.mxu1 %v1134_v2 }
  0x3f   :  { %1006 = vmatpush3.bf16.msra.mxu0 %v1133_v1 }
  0x40   :  { %1044 = vmatprep.subr.bf16.mxu0 %v1151_v6 }
  0x41   :  { %1028 = vmatpush3.bf16.msra.mxu1 %v1138_v5 }
  0x42   :  { %769 = vmatmul.mubr.bf16.vlgmr.msra.gmra.mxu0 %v1135_v3 }
  0x43   :  { %1060 = vmatprep.mubr.msk.bf16.mxu0 %vm1152_vm0, %v1151_v6  ;;  %1045 = vmatpush3.bf16.msra.mxu0 %v1142_v9 }
  0x44   :  { %810 = vmatmul.mubr.bf16.vlgmr.msra.gmra.mxu1 %v1139_v7  ;;  %1046 = vmatprep.subr.bf16.mxu0 %v1151_v6 }
  0x47   :  { %1047 = vmatpush3.bf16.msra.mxu0 %v1143_v10 }
  0x48   :  { %1048 = vmatprep.subr.bf16.mxu0 %v1151_v6 }
  0x4b   :  { %1049 = vmatpush3.bf16.msra.mxu0 %v1144_v11 }
  0x4c   :  { %1050 = vmatprep.subr.bf16.mxu0 %v1151_v6 }
  0x4f   :  { %1051 = vmatpush3.bf16.msra.mxu0 %v1145_v12 }
  0x50   :  { %1052 = vmatprep.subr.bf16.mxu0 %v1151_v6 }
  0x53   :  { %1053 = vmatpush3.bf16.msra.mxu0 %v1146_v13 }
  0x54   :  { %1054 = vmatprep.subr.bf16.mxu0 %v1151_v6 }
  0x57   :  { %1055 = vmatpush3.bf16.msra.mxu0 %v1147_v14 }
  0x58   :  { %1056 = vmatprep.subr.bf16.mxu0 %v1151_v6 }
  0x5b   :  { %1057 = vmatpush3.bf16.msra.mxu0 %v1148_v15 }
  0x5c   :  { %1058 = vmatprep.subr.bf16.mxu0 %v1151_v6 }
  0x5f   :  { %1059 = vmatpush3.bf16.msra.mxu0 %v1149_v16 }
  0x62   :  { %1061 = vmatmul.mubr.bf16.vlgmr.msra.gmra.mxu0 %v1150_v17 }
  0xe2   :  { %v963_v18 = vpop.f32.mrf.mxu0 }
  0xe4   :  { %v964_v19 = vpop.f32.mrf.mxu0  ;;  %v985_v20 = vpop.f32.mrf.mxu1 }
  0xe5   :  { %v965_v29 = vadd.f32 %v964_v19, %v963_v18 }
  0xe6   :  { %v966_v21 = vpop.f32.mrf.mxu0  ;;  %v986_v22 = vpop.f32.mrf.mxu1 }
  0xe7   :  { %v689_v33 = vadd.f32 %v965_v29, %v865_v30  ;;  %v987_v34 = vadd.f32 %v986_v22, %v985_v20 }
  0xe8   :  { %v967_v23 = vpop.f32.mrf.mxu0  ;;  %v988_v24 = vpop.f32.mrf.mxu1 }
  0xe9   :  { %v968_v35 = vadd.f32 %v967_v23, %v966_v21  ;;  %v730_v39 = vadd.f32 %v987_v34, %v689_v33 }
  0xea   :  { %v989_v26 = vpop.f32.mrf.mxu1 }
  0xeb   :  { %v692_v40 = vadd.f32 %v968_v35, %v865_v30  ;;  %v990_v41 = vadd.f32 %v989_v26, %v988_v24 }
  0xed   :  { %v733_v46 = vadd.f32 %v990_v41, %v692_v40 }
 0x102   :  { %v1007_v25 = vpop.f32.mrf.mxu0 }
 0x104   :  { %v1008_v27 = vpop.f32.mrf.mxu0  ;;  %v1029_v28 = vpop.f32.mrf.mxu1 }
 0x105   :  { %v1009_v36 = vadd.f32 %v1008_v27, %v1007_v25 }
 0x106   :  { %v1010_v31 = vpop.f32.mrf.mxu0  ;;  %v1030_v32 = vpop.f32.mrf.mxu1 }
 0x107   :  { %v771_v42 = vadd.f32 %v1009_v36, %v730_v39  ;;  %v1031_v43 = vadd.f32 %v1030_v32, %v1029_v28 }
 0x108   :  { %v1011_v37 = vpop.f32.mrf.mxu0  ;;  %v1032_v38 = vpop.f32.mrf.mxu1 }
 0x109   :  { %v1012_v44 = vadd.f32 %v1011_v37, %v1010_v31  ;;  %v812_v49 = vadd.f32 %v1031_v43, %v771_v42 }
 0x10a   :  { %v1033_v45 = vpop.f32.mrf.mxu1 }
 0x10b   :  { %v774_v47 = vadd.f32 %v1012_v44, %v733_v46  ;;  %v1034_v48 = vadd.f32 %v1033_v45, %v1032_v38 }
 0x10d   :  { %v815_v53 = vadd.f32 %v1034_v48, %v774_v47 }
 0x122   :  { %v852_v50 = vpop.f32.mrf.mxu0 }
 0x123   :  { %v853_v51 = vadd.f32 %v852_v50, %v812_v49 }
 0x124   :  { %v1062_v52 = vpop.f32.mrf.mxu0 }
 0x125   :  { %859 = vst [vmem:[%s1428_s3] sm:$0xff] %v853_v51 }
 0x126   :  { %v855_v54 = vpop.f32.mrf.mxu0 }
 0x127   :  { %v856_v55 = vadd.f32 %v855_v54, %v815_v53 }
 0x128   :  { %v1063_v56 = vpop.f32.mrf.mxu0 }
 0x129   :  { %860 = vst [vmem:[%s1428_s3 + $0x8] sm:$0xff] %v856_v55 }

</bundles_post_ra>
